<compile_context>
chip_gen: v6e
topology: v6e:2x2x1
jax: 0.10.0
libtpu: 0.0.40
codegen_flags: <defaults>
</compile_context>

<pallas_src>
import math
import functools

import jax
import jax.numpy as jnp
import numpy as np
from jax.experimental import pallas as pl
from jax.experimental.pallas import tpu as pltpu

INF = 10000000000.0


def multihead_kernel(q_ref, k_ref, v_ref, wq_ref, wk_ref, wv_ref, wo_ref,
                     o_ref, qp_s, m_s, l_s, acc_s, *,
                     n_heads, causal, tq, tk, compute_dtype, mask_val):
    """One (batch, q-tile, kv-tile) grid step.

    q_ref: (tq, Dk)   k_ref: (tk, Dk)   v_ref: (tk, Dv)
    wq_ref/wk_ref: (H, Dk, dh_k)  wv_ref: (H, Dv, dh_v)  wo_ref: (H, dh_v, Dk)
    o_ref: (tq, Dk)
    scratch: qp_s (H, tq, dh_k) [compute dtype], m_s/l_s (H, tq, 1) f32,
             acc_s (H, tq, dh_v) f32 — persist across the kv grid axis.
    """
    ki = pl.program_id(2)
    nk = pl.num_programs(2)

    # ---- init at the first kv step of this (batch, q-tile) -----------------
    @pl.when(ki == 0)
    def _init():
        q = q_ref[...]                                   # (tq, Dk)
        for h in range(n_heads):                         # static unroll
            # 1/sqrt(d_key) is already folded into wq on the host.
            qp = jnp.dot(q, wq_ref[h], preferred_element_type=jnp.float32)
            qp_s[h] = qp.astype(compute_dtype)
        m_s[...] = jnp.full_like(m_s, -jnp.inf)
        l_s[...] = jnp.zeros_like(l_s)
        acc_s[...] = jnp.zeros_like(acc_s)

    k = k_ref[...]                                       # (tk, Dk)
    v = v_ref[...]                                       # (tk, Dv)

    if causal:
        qi = pl.program_id(1)
        row = qi * tq + jax.lax.broadcasted_iota(jnp.int32, (tq, tk), 0)
        col = ki * tk + jax.lax.broadcasted_iota(jnp.int32, (tq, tk), 1)
        # Reference: softmax((qk - INF*triu)/scale) == (qk/scale) - (INF/scale).
        bias = jnp.where(col > row,
                         jnp.float32(-mask_val), jnp.float32(0.0))   # (tq, tk)

    # ---- per-head projections + online-softmax update -----------------------
    for h in range(n_heads):                             # static unroll
        kp = jnp.dot(k, wk_ref[h],
                     preferred_element_type=jnp.float32).astype(compute_dtype)
        vp = jnp.dot(v, wv_ref[h],
                     preferred_element_type=jnp.float32).astype(compute_dtype)

        # scores = qp @ kp^T without materializing a transpose of kp.
        s = jax.lax.dot_general(qp_s[h], kp,
                                dimension_numbers=(((1,), (1,)), ((), ())),
                                preferred_element_type=jnp.float32)   # (tq, tk)
        if causal:
            s = s + bias

        m_prev = m_s[h]                                  # (tq, 1) f32
        m_new = jnp.maximum(m_prev, jnp.max(s, axis=-1, keepdims=True))
        alpha = jnp.exp(m_prev - m_new)
        p = jnp.exp(s - m_new)                           # f32
        l_s[h] = alpha * l_s[h] + jnp.sum(p, axis=-1, keepdims=True)
        acc_s[h] = alpha * acc_s[h] + jnp.dot(p.astype(compute_dtype), vp,
                                              preferred_element_type=jnp.float32)
        m_s[h] = m_new

    # ---- finalize: normalize and fold each head straight into Wo -----------
    @pl.when(ki == nk - 1)
    def _finalize():
        out = jnp.zeros(o_ref.shape, jnp.float32)        # (tq, Dk)
        for h in range(n_heads):
            inv_l = pl.reciprocal(l_s[h], approx=True)   # EUP, off the VPU path
            ctx = (acc_s[h] * inv_l).astype(compute_dtype)   # (tq, dh_v)
            out = out + jnp.dot(ctx, wo_ref[h],
                                preferred_element_type=jnp.float32)
        o_ref[...] = out.astype(o_ref.dtype)


def _pick_tile(T, target):
    """Largest multiple-of-8 divisor of T that is <= target (else whole T)."""
    if T <= target:
        return T
    for cand in range(target, 7, -1):
        if T % cand == 0 and cand % 8 == 0:
            return cand
    return T


def multihead_forward(query, key, value, wq, wk, wv, wo, *, n_heads,
                      causal=False, compute_dtype=jnp.bfloat16,
                      q_block=256, kv_block=256):
    B, T, Dk = query.shape
    Dv = value.shape[-1]
    assert Dk % n_heads == 0 and Dv % n_heads == 0
    dh_k = Dk // n_heads
    dh_v = Dv // n_heads
    scale = math.sqrt(Dk)          # Attention(d_key, ...) -> scale = sqrt(d_key)
    inv_scale = 1.0 / scale

    tq = _pick_tile(T, q_block)
    tk = _pick_tile(T, kv_block)
    n_q = T // tq
    n_k = T // tk

    # Hoist transposes / head split / 1/scale out of the kernel (done once).
    wq_h = (wq.T * inv_scale).reshape(Dk, n_heads, dh_k).transpose(1, 0, 2)
    wk_h = wk.T.reshape(Dk, n_heads, dh_k).transpose(1, 0, 2)
    wv_h = wv.T.reshape(Dv, n_heads, dh_v).transpose(1, 0, 2)
    wo_h = wo.T.reshape(n_heads, dh_v, Dk)

    cd = compute_dtype
    q_c, k_c, v_c = (x.astype(cd) for x in (query, key, value))
    wq_h, wk_h, wv_h, wo_h = (w.astype(cd) for w in (wq_h, wk_h, wv_h, wo_h))

    kernel = functools.partial(
        multihead_kernel, n_heads=n_heads, causal=causal, tq=tq, tk=tk,
        compute_dtype=cd, mask_val=float(INF * inv_scale))

    return pl.pallas_call(
        kernel,
        out_shape=jax.ShapeDtypeStruct((B, T, Dk), jnp.float32),
        grid=(B, n_q, n_k),
        in_specs=[
            pl.BlockSpec((None, tq, Dk), lambda b, qi, ki: (b, qi, 0)),   # q
            pl.BlockSpec((None, tk, Dk), lambda b, qi, ki: (b, ki, 0)),   # k
            pl.BlockSpec((None, tk, Dv), lambda b, qi, ki: (b, ki, 0)),   # v
            pl.BlockSpec((n_heads, Dk, dh_k), lambda b, qi, ki: (0, 0, 0)),  # Wq
            pl.BlockSpec((n_heads, Dk, dh_k), lambda b, qi, ki: (0, 0, 0)),  # Wk
            pl.BlockSpec((n_heads, Dv, dh_v), lambda b, qi, ki: (0, 0, 0)),  # Wv
            pl.BlockSpec((n_heads, dh_v, Dk), lambda b, qi, ki: (0, 0, 0)),  # Wo
        ],
        out_specs=pl.BlockSpec((None, tq, Dk), lambda b, qi, ki: (b, qi, 0)),
        scratch_shapes=[
            pltpu.VMEM((n_heads, tq, dh_k), cd),           # projected, scaled q
            pltpu.VMEM((n_heads, tq, 1), jnp.float32),     # running max
            pltpu.VMEM((n_heads, tq, 1), jnp.float32),     # running denom
            pltpu.VMEM((n_heads, tq, dh_v), jnp.float32),  # running numerator
        ],
        compiler_params=pltpu.CompilerParams(
            dimension_semantics=("parallel", "parallel", "arbitrary")),
    )(q_c, k_c, v_c, wq_h, wk_h, wv_h, wo_h)


def multihead_reference(query, key, value, wq, wk, wv, wo, *, n_heads,
                        causal=False):
    """Pure-JAX f32 reference mirroring the PyTorch forward (dropout = id)."""
    Dk = query.shape[-1]
    scale = math.sqrt(Dk)
    qp = query @ wq.T
    kp = key @ wk.T
    vp = value @ wv.T
    qs = jnp.split(qp, n_heads, axis=-1)
    ks = jnp.split(kp, n_heads, axis=-1)
    vs = jnp.split(vp, n_heads, axis=-1)
    outs = []
    for qh, kh, vh in zip(qs, ks, vs):
        dots = jnp.einsum("btd,bsd->bts", qh, kh)
        if causal:
            T = kh.shape[1]
            tri = jnp.triu(jnp.ones((T, T), jnp.float32), 1) * INF
            dots = dots - tri[None]
        p = jax.nn.softmax(dots / scale, axis=-1)
        outs.append(jnp.einsum("bts,bsd->btd", p, vh))
    return jnp.concatenate(outs, axis=-1) @ wo.T


if __name__ == "__main__":
    # Small module-consistent shapes; blocks of 8 force a real (2x2) tile grid
    # so the online-softmax / causal-tile paths are exercised.
    B, T = 2, 16
    d_key, d_value, n_heads = 32, 32, 4

    key0 = jax.random.PRNGKey(0)
    kq, kk, kv, kwq, kwk, kwv, kwo = jax.random.split(key0, 7)

    query = jax.random.normal(kq, (B, T, d_key), dtype=jnp.float32)
    key_in = jax.random.normal(kk, (B, T, d_key), dtype=jnp.float32)
    value = jax.random.normal(kv, (B, T, d_value), dtype=jnp.float32)

    # nn.Linear weight shapes: (out_features, in_features), no bias.
    wq = jax.random.normal(kwq, (d_key, d_key), dtype=jnp.float32) * 0.1
    wk = jax.random.normal(kwk, (d_key, d_key), dtype=jnp.float32) * 0.1
    wv = jax.random.normal(kwv, (d_value, d_value), dtype=jnp.float32) * 0.1
    wo = jax.random.normal(kwo, (d_key, d_value), dtype=jnp.float32) * 0.1

    configs = [
        # (causal, compute_dtype, rtol, atol)
        (False, jnp.float32, 2e-2, 2e-3),
        (True, jnp.float32, 2e-2, 2e-3),
        (False, jnp.bfloat16, 5e-2, 2e-2),
        (True, jnp.bfloat16, 5e-2, 2e-2),
    ]
    for causal, cd, rtol, atol in configs:
        out = multihead_forward(query, key_in, value, wq, wk, wv, wo,
                                n_heads=n_heads, causal=causal,
                                compute_dtype=cd, q_block=8, kv_block=8)
        out = jax.block_until_ready(out)
        ref = multihead_reference(query, key_in, value, wq, wk, wv, wo,
                                  n_heads=n_heads, causal=causal)
        np.testing.assert_allclose(np.asarray(out), np.asarray(ref),
                                   rtol=rtol, atol=atol)

    print("KERNEL_OK")
</pallas_src>

<mosaic_0001>
module attributes {stable_mosaic.version = 11 : i64} {
  func.func @multihead_kernel(%arg0: i32, %arg1: i32, %arg2: i32, %arg3: memref<1x8x32xf32, #tpu.memory_space<vmem>>, %arg4: memref<1x8x32xf32, #tpu.memory_space<vmem>>, %arg5: memref<1x8x32xf32, #tpu.memory_space<vmem>>, %arg6: memref<4x32x8xf32, #tpu.memory_space<vmem>>, %arg7: memref<4x32x8xf32, #tpu.memory_space<vmem>>, %arg8: memref<4x32x8xf32, #tpu.memory_space<vmem>>, %arg9: memref<4x8x32xf32, #tpu.memory_space<vmem>>, %arg10: memref<1x8x32xf32, #tpu.memory_space<vmem>>, %arg11: memref<4x8x8xf32, #tpu.memory_space<vmem>>, %arg12: memref<4x8x1xf32, #tpu.memory_space<vmem>>, %arg13: memref<4x8x1xf32, #tpu.memory_space<vmem>>, %arg14: memref<4x8x8xf32, #tpu.memory_space<vmem>>) attributes {dimension_semantics = [#tpu.dimension_semantics<parallel>, #tpu.dimension_semantics<parallel>, #tpu.dimension_semantics<arbitrary>], iteration_bounds = array<i64: 2, 2, 2>, scalar_prefetch = 0 : i64, scratch_operands = 4 : i64, tpu.core_type = #tpu.core_type<tc>, window_params = [{transform_indices = @transform_0, window_bounds = array<i64: 1, 8, 32>}, {transform_indices = @transform_1, window_bounds = array<i64: 1, 8, 32>}, {transform_indices = @transform_2, window_bounds = array<i64: 1, 8, 32>}, {pipeline_mode = #tpu.pipeline_mode<synchronous>, transform_indices = @transform_3, window_bounds = array<i64: 4, 32, 8>}, {pipeline_mode = #tpu.pipeline_mode<synchronous>, transform_indices = @transform_4, window_bounds = array<i64: 4, 32, 8>}, {pipeline_mode = #tpu.pipeline_mode<synchronous>, transform_indices = @transform_5, window_bounds = array<i64: 4, 32, 8>}, {pipeline_mode = #tpu.pipeline_mode<synchronous>, transform_indices = @transform_6, window_bounds = array<i64: 4, 8, 32>}, {transform_indices = @transform_7, window_bounds = array<i64: 1, 8, 32>}]} {
    %c0_i32 = arith.constant 0 : i32
    %0 = arith.cmpi eq, %arg2, %c0_i32 : i32
    %1 = arith.extui %0 : i1 to i32
    %c0_i32_0 = arith.constant 0 : i32
    %2 = arith.cmpi ne, %1, %c0_i32_0 : i32
    scf.if %2 {
      %c0_135 = arith.constant 0 : index
      %c0_136 = arith.constant 0 : index
      %c0_137 = arith.constant 0 : index
      %170 = vector.load %arg3[%c0_135, %c0_136, %c0_137] : memref<1x8x32xf32, #tpu.memory_space<vmem>>, vector<1x8x32xf32>
      %171 = vector.shape_cast %170 : vector<1x8x32xf32> to vector<8x32xf32>
      %c0_138 = arith.constant 0 : index
      %c0_139 = arith.constant 0 : index
      %c0_140 = arith.constant 0 : index
      %172 = vector.load %arg6[%c0_138, %c0_139, %c0_140] : memref<4x32x8xf32, #tpu.memory_space<vmem>>, vector<1x32x8xf32>
      %173 = vector.shape_cast %172 : vector<1x32x8xf32> to vector<32x8xf32>
      %cst_141 = arith.constant dense<0.000000e+00> : vector<8x8xf32>
      %174 = tpu.matmul %171, %173, %cst_141 {dimension_numbers = #tpu.dot_dimension_numbers<[1], [0], [0], [1], [0, 0, 1, 1], [], []>} : vector<8x32xf32>, vector<32x8xf32>, vector<8x8xf32> -> vector<8x8xf32>
      %c0_142 = arith.constant 0 : index
      %c0_143 = arith.constant 0 : index
      %c0_144 = arith.constant 0 : index
      %175 = vector.load %arg11[%c0_142, %c0_143, %c0_144] : memref<4x8x8xf32, #tpu.memory_space<vmem>>, vector<1x8x8xf32>
      %176 = vector.shape_cast %175 : vector<1x8x8xf32> to vector<8x8xf32>
      %177 = vector.shape_cast %174 : vector<8x8xf32> to vector<1x8x8xf32>
      tpu.vector_store %arg11[%c0_142, %c0_143, %c0_144], %177 {strides = array<i32>} : memref<4x8x8xf32, #tpu.memory_space<vmem>>, vector<1x8x8xf32>,
      %c1_145 = arith.constant 1 : index
      %c0_146 = arith.constant 0 : index
      %c0_147 = arith.constant 0 : index
      %178 = vector.load %arg6[%c1_145, %c0_146, %c0_147] : memref<4x32x8xf32, #tpu.memory_space<vmem>>, vector<1x32x8xf32>
      %179 = vector.shape_cast %178 : vector<1x32x8xf32> to vector<32x8xf32>
      %cst_148 = arith.constant dense<0.000000e+00> : vector<8x8xf32>
      %180 = tpu.matmul %171, %179, %cst_148 {dimension_numbers = #tpu.dot_dimension_numbers<[1], [0], [0], [1], [0, 0, 1, 1], [], []>} : vector<8x32xf32>, vector<32x8xf32>, vector<8x8xf32> -> vector<8x8xf32>
      %c1_149 = arith.constant 1 : index
      %c0_150 = arith.constant 0 : index
      %c0_151 = arith.constant 0 : index
      %181 = vector.load %arg11[%c1_149, %c0_150, %c0_151] : memref<4x8x8xf32, #tpu.memory_space<vmem>>, vector<1x8x8xf32>
      %182 = vector.shape_cast %181 : vector<1x8x8xf32> to vector<8x8xf32>
      %183 = vector.shape_cast %180 : vector<8x8xf32> to vector<1x8x8xf32>
      tpu.vector_store %arg11[%c1_149, %c0_150, %c0_151], %183 {strides = array<i32>} : memref<4x8x8xf32, #tpu.memory_space<vmem>>, vector<1x8x8xf32>,
      %c2_152 = arith.constant 2 : index
      %c0_153 = arith.constant 0 : index
      %c0_154 = arith.constant 0 : index
      %184 = vector.load %arg6[%c2_152, %c0_153, %c0_154] : memref<4x32x8xf32, #tpu.memory_space<vmem>>, vector<1x32x8xf32>
      %185 = vector.shape_cast %184 : vector<1x32x8xf32> to vector<32x8xf32>
      %cst_155 = arith.constant dense<0.000000e+00> : vector<8x8xf32>
      %186 = tpu.matmul %171, %185, %cst_155 {dimension_numbers = #tpu.dot_dimension_numbers<[1], [0], [0], [1], [0, 0, 1, 1], [], []>} : vector<8x32xf32>, vector<32x8xf32>, vector<8x8xf32> -> vector<8x8xf32>
      %c2_156 = arith.constant 2 : index
      %c0_157 = arith.constant 0 : index
      %c0_158 = arith.constant 0 : index
      %187 = vector.load %arg11[%c2_156, %c0_157, %c0_158] : memref<4x8x8xf32, #tpu.memory_space<vmem>>, vector<1x8x8xf32>
      %188 = vector.shape_cast %187 : vector<1x8x8xf32> to vector<8x8xf32>
      %189 = vector.shape_cast %186 : vector<8x8xf32> to vector<1x8x8xf32>
      tpu.vector_store %arg11[%c2_156, %c0_157, %c0_158], %189 {strides = array<i32>} : memref<4x8x8xf32, #tpu.memory_space<vmem>>, vector<1x8x8xf32>,
      %c3_159 = arith.constant 3 : index
      %c0_160 = arith.constant 0 : index
      %c0_161 = arith.constant 0 : index
      %190 = vector.load %arg6[%c3_159, %c0_160, %c0_161] : memref<4x32x8xf32, #tpu.memory_space<vmem>>, vector<1x32x8xf32>
      %191 = vector.shape_cast %190 : vector<1x32x8xf32> to vector<32x8xf32>
      %cst_162 = arith.constant dense<0.000000e+00> : vector<8x8xf32>
      %192 = tpu.matmul %171, %191, %cst_162 {dimension_numbers = #tpu.dot_dimension_numbers<[1], [0], [0], [1], [0, 0, 1, 1], [], []>} : vector<8x32xf32>, vector<32x8xf32>, vector<8x8xf32> -> vector<8x8xf32>
      %c3_163 = arith.constant 3 : index
      %c0_164 = arith.constant 0 : index
      %c0_165 = arith.constant 0 : index
      %193 = vector.load %arg11[%c3_163, %c0_164, %c0_165] : memref<4x8x8xf32, #tpu.memory_space<vmem>>, vector<1x8x8xf32>
      %194 = vector.shape_cast %193 : vector<1x8x8xf32> to vector<8x8xf32>
      %195 = vector.shape_cast %192 : vector<8x8xf32> to vector<1x8x8xf32>
      tpu.vector_store %arg11[%c3_163, %c0_164, %c0_165], %195 {strides = array<i32>} : memref<4x8x8xf32, #tpu.memory_space<vmem>>, vector<1x8x8xf32>,
      %cst_166 = arith.constant 0xFF800000 : f32
      %196 = vector.broadcast %cst_166 : f32 to vector<4x8x1xf32>
      %c0_167 = arith.constant 0 : index
      %c0_168 = arith.constant 0 : index
      %c0_169 = arith.constant 0 : index
      %197 = vector.load %arg12[%c0_167, %c0_168, %c0_169] : memref<4x8x1xf32, #tpu.memory_space<vmem>>, vector<4x8x1xf32>
      tpu.vector_store %arg12[%c0_167, %c0_168, %c0_169], %196 {strides = array<i32>} : memref<4x8x1xf32, #tpu.memory_space<vmem>>, vector<4x8x1xf32>,
      %cst_170 = arith.constant 0.000000e+00 : f32
      %198 = vector.broadcast %cst_170 : f32 to vector<4x8x1xf32>
      %c0_171 = arith.constant 0 : index
      %c0_172 = arith.constant 0 : index
      %c0_173 = arith.constant 0 : index
      %199 = vector.load %arg13[%c0_171, %c0_172, %c0_173] : memref<4x8x1xf32, #tpu.memory_space<vmem>>, vector<4x8x1xf32>
      tpu.vector_store %arg13[%c0_171, %c0_172, %c0_173], %198 {strides = array<i32>} : memref<4x8x1xf32, #tpu.memory_space<vmem>>, vector<4x8x1xf32>,
      %cst_174 = arith.constant 0.000000e+00 : f32
      %200 = vector.broadcast %cst_174 : f32 to vector<4x8x8xf32>
      %c0_175 = arith.constant 0 : index
      %c0_176 = arith.constant 0 : index
      %c0_177 = arith.constant 0 : index
      %201 = vector.load %arg14[%c0_175, %c0_176, %c0_177] : memref<4x8x8xf32, #tpu.memory_space<vmem>>, vector<4x8x8xf32>
      tpu.vector_store %arg14[%c0_175, %c0_176, %c0_177], %200 {strides = array<i32>} : memref<4x8x8xf32, #tpu.memory_space<vmem>>, vector<4x8x8xf32>,
    } else {
    }
    %c0 = arith.constant 0 : index
    %c0_1 = arith.constant 0 : index
    %c0_2 = arith.constant 0 : index
    %3 = vector.load %arg4[%c0, %c0_1, %c0_2] : memref<1x8x32xf32, #tpu.memory_space<vmem>>, vector<1x8x32xf32>
    %4 = vector.shape_cast %3 : vector<1x8x32xf32> to vector<8x32xf32>
    %c0_3 = arith.constant 0 : index
    %c0_4 = arith.constant 0 : index
    %c0_5 = arith.constant 0 : index
    %5 = vector.load %arg5[%c0_3, %c0_4, %c0_5] : memref<1x8x32xf32, #tpu.memory_space<vmem>>, vector<1x8x32xf32>
    %6 = vector.shape_cast %5 : vector<1x8x32xf32> to vector<8x32xf32>
    %c0_6 = arith.constant 0 : index
    %c0_7 = arith.constant 0 : index
    %c0_8 = arith.constant 0 : index
    %7 = vector.load %arg7[%c0_6, %c0_7, %c0_8] : memref<4x32x8xf32, #tpu.memory_space<vmem>>, vector<1x32x8xf32>
    %8 = vector.shape_cast %7 : vector<1x32x8xf32> to vector<32x8xf32>
    %cst = arith.constant dense<0.000000e+00> : vector<8x8xf32>
    %9 = tpu.matmul %4, %8, %cst {dimension_numbers = #tpu.dot_dimension_numbers<[1], [0], [0], [1], [0, 0, 1, 1], [], []>} : vector<8x32xf32>, vector<32x8xf32>, vector<8x8xf32> -> vector<8x8xf32>
    %c0_9 = arith.constant 0 : index
    %c0_10 = arith.constant 0 : index
    %c0_11 = arith.constant 0 : index
    %10 = vector.load %arg8[%c0_9, %c0_10, %c0_11] : memref<4x32x8xf32, #tpu.memory_space<vmem>>, vector<1x32x8xf32>
    %11 = vector.shape_cast %10 : vector<1x32x8xf32> to vector<32x8xf32>
    %cst_12 = arith.constant dense<0.000000e+00> : vector<8x8xf32>
    %12 = tpu.matmul %6, %11, %cst_12 {dimension_numbers = #tpu.dot_dimension_numbers<[1], [0], [0], [1], [0, 0, 1, 1], [], []>} : vector<8x32xf32>, vector<32x8xf32>, vector<8x8xf32> -> vector<8x8xf32>
    %c0_13 = arith.constant 0 : index
    %c0_14 = arith.constant 0 : index
    %c0_15 = arith.constant 0 : index
    %13 = vector.load %arg11[%c0_13, %c0_14, %c0_15] : memref<4x8x8xf32, #tpu.memory_space<vmem>>, vector<1x8x8xf32>
    %14 = vector.shape_cast %13 : vector<1x8x8xf32> to vector<8x8xf32>
    %cst_16 = arith.constant dense<0.000000e+00> : vector<8x8xf32>
    %15 = tpu.matmul %14, %9, %cst_16 {dimension_numbers = #tpu.dot_dimension_numbers<[1], [1], [0], [0], [0, 0, 1, 0], [], []>} : vector<8x8xf32>, vector<8x8xf32>, vector<8x8xf32> -> vector<8x8xf32>
    %c0_17 = arith.constant 0 : index
    %c0_18 = arith.constant 0 : index
    %c0_19 = arith.constant 0 : index
    %16 = vector.load %arg12[%c0_17, %c0_18, %c0_19] : memref<4x8x1xf32, #tpu.memory_space<vmem>>, vector<1x8x1xf32>
    %17 = vector.shape_cast %16 : vector<1x8x1xf32> to vector<8x1xf32>
    %cst_20 = arith.constant dense<0xFF800000> : vector<8xf32>
    %18 = vector.multi_reduction <maximumf>, %15, %cst_20 [1] : vector<8x8xf32> to vector<8xf32>
    %19 = vector.shape_cast %18 : vector<8xf32> to vector<8x1xf32>
    %20 = arith.maximumf %17, %19 : vector<8x1xf32>
    %21 = arith.subf %17, %20 : vector<8x1xf32>
    %22 = math.exp %21 : vector<8x1xf32>
    %23 = vector.broadcast %20 : vector<8x1xf32> to vector<8x8xf32>
    %24 = arith.subf %15, %23 : vector<8x8xf32>
    %25 = math.exp %24 : vector<8x8xf32>
    %c0_21 = arith.constant 0 : index
    %c0_22 = arith.constant 0 : index
    %c0_23 = arith.constant 0 : index
    %26 = vector.load %arg13[%c0_21, %c0_22, %c0_23] : memref<4x8x1xf32, #tpu.memory_space<vmem>>, vector<1x8x1xf32>
    %27 = vector.shape_cast %26 : vector<1x8x1xf32> to vector<8x1xf32>
    %28 = arith.mulf %22, %27 : vector<8x1xf32>
    %cst_24 = arith.constant dense<0.000000e+00> : vector<8xf32>
    %29 = vector.multi_reduction <add>, %25, %cst_24 [1] : vector<8x8xf32> to vector<8xf32>
    %30 = vector.shape_cast %29 : vector<8xf32> to vector<8x1xf32>
    %31 = arith.addf %28, %30 : vector<8x1xf32>
    %c0_25 = arith.constant 0 : index
    %c0_26 = arith.constant 0 : index
    %c0_27 = arith.constant 0 : index
    %32 = vector.load %arg13[%c0_25, %c0_26, %c0_27] : memref<4x8x1xf32, #tpu.memory_space<vmem>>, vector<1x8x1xf32>
    %33 = vector.shape_cast %32 : vector<1x8x1xf32> to vector<8x1xf32>
    %34 = vector.shape_cast %31 : vector<8x1xf32> to vector<1x8x1xf32>
    tpu.vector_store %arg13[%c0_25, %c0_26, %c0_27], %34 {strides = array<i32>} : memref<4x8x1xf32, #tpu.memory_space<vmem>>, vector<1x8x1xf32>,
    %c0_28 = arith.constant 0 : index
    %c0_29 = arith.constant 0 : index
    %c0_30 = arith.constant 0 : index
    %35 = vector.load %arg14[%c0_28, %c0_29, %c0_30] : memref<4x8x8xf32, #tpu.memory_space<vmem>>, vector<1x8x8xf32>
    %36 = vector.shape_cast %35 : vector<1x8x8xf32> to vector<8x8xf32>
    %37 = vector.broadcast %22 : vector<8x1xf32> to vector<8x8xf32>
    %38 = arith.mulf %37, %36 : vector<8x8xf32>
    %cst_31 = arith.constant dense<0.000000e+00> : vector<8x8xf32>
    %39 = tpu.matmul %25, %12, %cst_31 {dimension_numbers = #tpu.dot_dimension_numbers<[1], [0], [0], [1], [0, 0, 1, 1], [], []>} : vector<8x8xf32>, vector<8x8xf32>, vector<8x8xf32> -> vector<8x8xf32>
    %40 = arith.addf %38, %39 : vector<8x8xf32>
    %c0_32 = arith.constant 0 : index
    %c0_33 = arith.constant 0 : index
    %c0_34 = arith.constant 0 : index
    %41 = vector.load %arg14[%c0_32, %c0_33, %c0_34] : memref<4x8x8xf32, #tpu.memory_space<vmem>>, vector<1x8x8xf32>
    %42 = vector.shape_cast %41 : vector<1x8x8xf32> to vector<8x8xf32>
    %43 = vector.shape_cast %40 : vector<8x8xf32> to vector<1x8x8xf32>
    tpu.vector_store %arg14[%c0_32, %c0_33, %c0_34], %43 {strides = array<i32>} : memref<4x8x8xf32, #tpu.memory_space<vmem>>, vector<1x8x8xf32>,
    %c0_35 = arith.constant 0 : index
    %c0_36 = arith.constant 0 : index
    %c0_37 = arith.constant 0 : index
    %44 = vector.load %arg12[%c0_35, %c0_36, %c0_37] : memref<4x8x1xf32, #tpu.memory_space<vmem>>, vector<1x8x1xf32>
    %45 = vector.shape_cast %44 : vector<1x8x1xf32> to vector<8x1xf32>
    %46 = vector.shape_cast %20 : vector<8x1xf32> to vector<1x8x1xf32>
    tpu.vector_store %arg12[%c0_35, %c0_36, %c0_37], %46 {strides = array<i32>} : memref<4x8x1xf32, #tpu.memory_space<vmem>>, vector<1x8x1xf32>,
    %c1 = arith.constant 1 : index
    %c0_38 = arith.constant 0 : index
    %c0_39 = arith.constant 0 : index
    %47 = vector.load %arg7[%c1, %c0_38, %c0_39] : memref<4x32x8xf32, #tpu.memory_space<vmem>>, vector<1x32x8xf32>
    %48 = vector.shape_cast %47 : vector<1x32x8xf32> to vector<32x8xf32>
    %cst_40 = arith.constant dense<0.000000e+00> : vector<8x8xf32>
    %49 = tpu.matmul %4, %48, %cst_40 {dimension_numbers = #tpu.dot_dimension_numbers<[1], [0], [0], [1], [0, 0, 1, 1], [], []>} : vector<8x32xf32>, vector<32x8xf32>, vector<8x8xf32> -> vector<8x8xf32>
    %c1_41 = arith.constant 1 : index
    %c0_42 = arith.constant 0 : index
    %c0_43 = arith.constant 0 : index
    %50 = vector.load %arg8[%c1_41, %c0_42, %c0_43] : memref<4x32x8xf32, #tpu.memory_space<vmem>>, vector<1x32x8xf32>
    %51 = vector.shape_cast %50 : vector<1x32x8xf32> to vector<32x8xf32>
    %cst_44 = arith.constant dense<0.000000e+00> : vector<8x8xf32>
    %52 = tpu.matmul %6, %51, %cst_44 {dimension_numbers = #tpu.dot_dimension_numbers<[1], [0], [0], [1], [0, 0, 1, 1], [], []>} : vector<8x32xf32>, vector<32x8xf32>, vector<8x8xf32> -> vector<8x8xf32>
    %c1_45 = arith.constant 1 : index
    %c0_46 = arith.constant 0 : index
    %c0_47 = arith.constant 0 : index
    %53 = vector.load %arg11[%c1_45, %c0_46, %c0_47] : memref<4x8x8xf32, #tpu.memory_space<vmem>>, vector<1x8x8xf32>
    %54 = vector.shape_cast %53 : vector<1x8x8xf32> to vector<8x8xf32>
    %cst_48 = arith.constant dense<0.000000e+00> : vector<8x8xf32>
    %55 = tpu.matmul %54, %49, %cst_48 {dimension_numbers = #tpu.dot_dimension_numbers<[1], [1], [0], [0], [0, 0, 1, 0], [], []>} : vector<8x8xf32>, vector<8x8xf32>, vector<8x8xf32> -> vector<8x8xf32>
    %c1_49 = arith.constant 1 : index
    %c0_50 = arith.constant 0 : index
    %c0_51 = arith.constant 0 : index
    %56 = vector.load %arg12[%c1_49, %c0_50, %c0_51] : memref<4x8x1xf32, #tpu.memory_space<vmem>>, vector<1x8x1xf32>
    %57 = vector.shape_cast %56 : vector<1x8x1xf32> to vector<8x1xf32>
    %cst_52 = arith.constant dense<0xFF800000> : vector<8xf32>
    %58 = vector.multi_reduction <maximumf>, %55, %cst_52 [1] : vector<8x8xf32> to vector<8xf32>
    %59 = vector.shape_cast %58 : vector<8xf32> to vector<8x1xf32>
    %60 = arith.maximumf %57, %59 : vector<8x1xf32>
    %61 = arith.subf %57, %60 : vector<8x1xf32>
    %62 = math.exp %61 : vector<8x1xf32>
    %63 = vector.broadcast %60 : vector<8x1xf32> to vector<8x8xf32>
    %64 = arith.subf %55, %63 : vector<8x8xf32>
    %65 = math.exp %64 : vector<8x8xf32>
    %c1_53 = arith.constant 1 : index
    %c0_54 = arith.constant 0 : index
    %c0_55 = arith.constant 0 : index
    %66 = vector.load %arg13[%c1_53, %c0_54, %c0_55] : memref<4x8x1xf32, #tpu.memory_space<vmem>>, vector<1x8x1xf32>
    %67 = vector.shape_cast %66 : vector<1x8x1xf32> to vector<8x1xf32>
    %68 = arith.mulf %62, %67 : vector<8x1xf32>
    %cst_56 = arith.constant dense<0.000000e+00> : vector<8xf32>
    %69 = vector.multi_reduction <add>, %65, %cst_56 [1] : vector<8x8xf32> to vector<8xf32>
    %70 = vector.shape_cast %69 : vector<8xf32> to vector<8x1xf32>
    %71 = arith.addf %68, %70 : vector<8x1xf32>
    %c1_57 = arith.constant 1 : index
    %c0_58 = arith.constant 0 : index
    %c0_59 = arith.constant 0 : index
    %72 = vector.load %arg13[%c1_57, %c0_58, %c0_59] : memref<4x8x1xf32, #tpu.memory_space<vmem>>, vector<1x8x1xf32>
    %73 = vector.shape_cast %72 : vector<1x8x1xf32> to vector<8x1xf32>
    %74 = vector.shape_cast %71 : vector<8x1xf32> to vector<1x8x1xf32>
    tpu.vector_store %arg13[%c1_57, %c0_58, %c0_59], %74 {strides = array<i32>} : memref<4x8x1xf32, #tpu.memory_space<vmem>>, vector<1x8x1xf32>,
    %c1_60 = arith.constant 1 : index
    %c0_61 = arith.constant 0 : index
    %c0_62 = arith.constant 0 : index
    %75 = vector.load %arg14[%c1_60, %c0_61, %c0_62] : memref<4x8x8xf32, #tpu.memory_space<vmem>>, vector<1x8x8xf32>
    %76 = vector.shape_cast %75 : vector<1x8x8xf32> to vector<8x8xf32>
    %77 = vector.broadcast %62 : vector<8x1xf32> to vector<8x8xf32>
    %78 = arith.mulf %77, %76 : vector<8x8xf32>
    %cst_63 = arith.constant dense<0.000000e+00> : vector<8x8xf32>
    %79 = tpu.matmul %65, %52, %cst_63 {dimension_numbers = #tpu.dot_dimension_numbers<[1], [0], [0], [1], [0, 0, 1, 1], [], []>} : vector<8x8xf32>, vector<8x8xf32>, vector<8x8xf32> -> vector<8x8xf32>
    %80 = arith.addf %78, %79 : vector<8x8xf32>
    %c1_64 = arith.constant 1 : index
    %c0_65 = arith.constant 0 : index
    %c0_66 = arith.constant 0 : index
    %81 = vector.load %arg14[%c1_64, %c0_65, %c0_66] : memref<4x8x8xf32, #tpu.memory_space<vmem>>, vector<1x8x8xf32>
    %82 = vector.shape_cast %81 : vector<1x8x8xf32> to vector<8x8xf32>
    %83 = vector.shape_cast %80 : vector<8x8xf32> to vector<1x8x8xf32>
    tpu.vector_store %arg14[%c1_64, %c0_65, %c0_66], %83 {strides = array<i32>} : memref<4x8x8xf32, #tpu.memory_space<vmem>>, vector<1x8x8xf32>,
    %c1_67 = arith.constant 1 : index
    %c0_68 = arith.constant 0 : index
    %c0_69 = arith.constant 0 : index
    %84 = vector.load %arg12[%c1_67, %c0_68, %c0_69] : memref<4x8x1xf32, #tpu.memory_space<vmem>>, vector<1x8x1xf32>
    %85 = vector.shape_cast %84 : vector<1x8x1xf32> to vector<8x1xf32>
    %86 = vector.shape_cast %60 : vector<8x1xf32> to vector<1x8x1xf32>
    tpu.vector_store %arg12[%c1_67, %c0_68, %c0_69], %86 {strides = array<i32>} : memref<4x8x1xf32, #tpu.memory_space<vmem>>, vector<1x8x1xf32>,
    %c2 = arith.constant 2 : index
    %c0_70 = arith.constant 0 : index
    %c0_71 = arith.constant 0 : index
    %87 = vector.load %arg7[%c2, %c0_70, %c0_71] : memref<4x32x8xf32, #tpu.memory_space<vmem>>, vector<1x32x8xf32>
    %88 = vector.shape_cast %87 : vector<1x32x8xf32> to vector<32x8xf32>
    %cst_72 = arith.constant dense<0.000000e+00> : vector<8x8xf32>
    %89 = tpu.matmul %4, %88, %cst_72 {dimension_numbers = #tpu.dot_dimension_numbers<[1], [0], [0], [1], [0, 0, 1, 1], [], []>} : vector<8x32xf32>, vector<32x8xf32>, vector<8x8xf32> -> vector<8x8xf32>
    %c2_73 = arith.constant 2 : index
    %c0_74 = arith.constant 0 : index
    %c0_75 = arith.constant 0 : index
    %90 = vector.load %arg8[%c2_73, %c0_74, %c0_75] : memref<4x32x8xf32, #tpu.memory_space<vmem>>, vector<1x32x8xf32>
    %91 = vector.shape_cast %90 : vector<1x32x8xf32> to vector<32x8xf32>
    %cst_76 = arith.constant dense<0.000000e+00> : vector<8x8xf32>
    %92 = tpu.matmul %6, %91, %cst_76 {dimension_numbers = #tpu.dot_dimension_numbers<[1], [0], [0], [1], [0, 0, 1, 1], [], []>} : vector<8x32xf32>, vector<32x8xf32>, vector<8x8xf32> -> vector<8x8xf32>
    %c2_77 = arith.constant 2 : index
    %c0_78 = arith.constant 0 : index
    %c0_79 = arith.constant 0 : index
    %93 = vector.load %arg11[%c2_77, %c0_78, %c0_79] : memref<4x8x8xf32, #tpu.memory_space<vmem>>, vector<1x8x8xf32>
    %94 = vector.shape_cast %93 : vector<1x8x8xf32> to vector<8x8xf32>
    %cst_80 = arith.constant dense<0.000000e+00> : vector<8x8xf32>
    %95 = tpu.matmul %94, %89, %cst_80 {dimension_numbers = #tpu.dot_dimension_numbers<[1], [1], [0], [0], [0, 0, 1, 0], [], []>} : vector<8x8xf32>, vector<8x8xf32>, vector<8x8xf32> -> vector<8x8xf32>
    %c2_81 = arith.constant 2 : index
    %c0_82 = arith.constant 0 : index
    %c0_83 = arith.constant 0 : index
    %96 = vector.load %arg12[%c2_81, %c0_82, %c0_83] : memref<4x8x1xf32, #tpu.memory_space<vmem>>, vector<1x8x1xf32>
    %97 = vector.shape_cast %96 : vector<1x8x1xf32> to vector<8x1xf32>
    %cst_84 = arith.constant dense<0xFF800000> : vector<8xf32>
    %98 = vector.multi_reduction <maximumf>, %95, %cst_84 [1] : vector<8x8xf32> to vector<8xf32>
    %99 = vector.shape_cast %98 : vector<8xf32> to vector<8x1xf32>
    %100 = arith.maximumf %97, %99 : vector<8x1xf32>
    %101 = arith.subf %97, %100 : vector<8x1xf32>
    %102 = math.exp %101 : vector<8x1xf32>
    %103 = vector.broadcast %100 : vector<8x1xf32> to vector<8x8xf32>
    %104 = arith.subf %95, %103 : vector<8x8xf32>
    %105 = math.exp %104 : vector<8x8xf32>
    %c2_85 = arith.constant 2 : index
    %c0_86 = arith.constant 0 : index
    %c0_87 = arith.constant 0 : index
    %106 = vector.load %arg13[%c2_85, %c0_86, %c0_87] : memref<4x8x1xf32, #tpu.memory_space<vmem>>, vector<1x8x1xf32>
    %107 = vector.shape_cast %106 : vector<1x8x1xf32> to vector<8x1xf32>
    %108 = arith.mulf %102, %107 : vector<8x1xf32>
    %cst_88 = arith.constant dense<0.000000e+00> : vector<8xf32>
    %109 = vector.multi_reduction <add>, %105, %cst_88 [1] : vector<8x8xf32> to vector<8xf32>
    %110 = vector.shape_cast %109 : vector<8xf32> to vector<8x1xf32>
    %111 = arith.addf %108, %110 : vector<8x1xf32>
    %c2_89 = arith.constant 2 : index
    %c0_90 = arith.constant 0 : index
    %c0_91 = arith.constant 0 : index
    %112 = vector.load %arg13[%c2_89, %c0_90, %c0_91] : memref<4x8x1xf32, #tpu.memory_space<vmem>>, vector<1x8x1xf32>
    %113 = vector.shape_cast %112 : vector<1x8x1xf32> to vector<8x1xf32>
    %114 = vector.shape_cast %111 : vector<8x1xf32> to vector<1x8x1xf32>
    tpu.vector_store %arg13[%c2_89, %c0_90, %c0_91], %114 {strides = array<i32>} : memref<4x8x1xf32, #tpu.memory_space<vmem>>, vector<1x8x1xf32>,
    %c2_92 = arith.constant 2 : index
    %c0_93 = arith.constant 0 : index
    %c0_94 = arith.constant 0 : index
    %115 = vector.load %arg14[%c2_92, %c0_93, %c0_94] : memref<4x8x8xf32, #tpu.memory_space<vmem>>, vector<1x8x8xf32>
    %116 = vector.shape_cast %115 : vector<1x8x8xf32> to vector<8x8xf32>
    %117 = vector.broadcast %102 : vector<8x1xf32> to vector<8x8xf32>
    %118 = arith.mulf %117, %116 : vector<8x8xf32>
    %cst_95 = arith.constant dense<0.000000e+00> : vector<8x8xf32>
    %119 = tpu.matmul %105, %92, %cst_95 {dimension_numbers = #tpu.dot_dimension_numbers<[1], [0], [0], [1], [0, 0, 1, 1], [], []>} : vector<8x8xf32>, vector<8x8xf32>, vector<8x8xf32> -> vector<8x8xf32>
    %120 = arith.addf %118, %119 : vector<8x8xf32>
    %c2_96 = arith.constant 2 : index
    %c0_97 = arith.constant 0 : index
    %c0_98 = arith.constant 0 : index
    %121 = vector.load %arg14[%c2_96, %c0_97, %c0_98] : memref<4x8x8xf32, #tpu.memory_space<vmem>>, vector<1x8x8xf32>
    %122 = vector.shape_cast %121 : vector<1x8x8xf32> to vector<8x8xf32>
    %123 = vector.shape_cast %120 : vector<8x8xf32> to vector<1x8x8xf32>
    tpu.vector_store %arg14[%c2_96, %c0_97, %c0_98], %123 {strides = array<i32>} : memref<4x8x8xf32, #tpu.memory_space<vmem>>, vector<1x8x8xf32>,
    %c2_99 = arith.constant 2 : index
    %c0_100 = arith.constant 0 : index
    %c0_101 = arith.constant 0 : index
    %124 = vector.load %arg12[%c2_99, %c0_100, %c0_101] : memref<4x8x1xf32, #tpu.memory_space<vmem>>, vector<1x8x1xf32>
    %125 = vector.shape_cast %124 : vector<1x8x1xf32> to vector<8x1xf32>
    %126 = vector.shape_cast %100 : vector<8x1xf32> to vector<1x8x1xf32>
    tpu.vector_store %arg12[%c2_99, %c0_100, %c0_101], %126 {strides = array<i32>} : memref<4x8x1xf32, #tpu.memory_space<vmem>>, vector<1x8x1xf32>,
    %c3 = arith.constant 3 : index
    %c0_102 = arith.constant 0 : index
    %c0_103 = arith.constant 0 : index
    %127 = vector.load %arg7[%c3, %c0_102, %c0_103] : memref<4x32x8xf32, #tpu.memory_space<vmem>>, vector<1x32x8xf32>
    %128 = vector.shape_cast %127 : vector<1x32x8xf32> to vector<32x8xf32>
    %cst_104 = arith.constant dense<0.000000e+00> : vector<8x8xf32>
    %129 = tpu.matmul %4, %128, %cst_104 {dimension_numbers = #tpu.dot_dimension_numbers<[1], [0], [0], [1], [0, 0, 1, 1], [], []>} : vector<8x32xf32>, vector<32x8xf32>, vector<8x8xf32> -> vector<8x8xf32>
    %c3_105 = arith.constant 3 : index
    %c0_106 = arith.constant 0 : index
    %c0_107 = arith.constant 0 : index
    %130 = vector.load %arg8[%c3_105, %c0_106, %c0_107] : memref<4x32x8xf32, #tpu.memory_space<vmem>>, vector<1x32x8xf32>
    %131 = vector.shape_cast %130 : vector<1x32x8xf32> to vector<32x8xf32>
    %cst_108 = arith.constant dense<0.000000e+00> : vector<8x8xf32>
    %132 = tpu.matmul %6, %131, %cst_108 {dimension_numbers = #tpu.dot_dimension_numbers<[1], [0], [0], [1], [0, 0, 1, 1], [], []>} : vector<8x32xf32>, vector<32x8xf32>, vector<8x8xf32> -> vector<8x8xf32>
    %c3_109 = arith.constant 3 : index
    %c0_110 = arith.constant 0 : index
    %c0_111 = arith.constant 0 : index
    %133 = vector.load %arg11[%c3_109, %c0_110, %c0_111] : memref<4x8x8xf32, #tpu.memory_space<vmem>>, vector<1x8x8xf32>
    %134 = vector.shape_cast %133 : vector<1x8x8xf32> to vector<8x8xf32>
    %cst_112 = arith.constant dense<0.000000e+00> : vector<8x8xf32>
    %135 = tpu.matmul %134, %129, %cst_112 {dimension_numbers = #tpu.dot_dimension_numbers<[1], [1], [0], [0], [0, 0, 1, 0], [], []>} : vector<8x8xf32>, vector<8x8xf32>, vector<8x8xf32> -> vector<8x8xf32>
    %c3_113 = arith.constant 3 : index
    %c0_114 = arith.constant 0 : index
    %c0_115 = arith.constant 0 : index
    %136 = vector.load %arg12[%c3_113, %c0_114, %c0_115] : memref<4x8x1xf32, #tpu.memory_space<vmem>>, vector<1x8x1xf32>
    %137 = vector.shape_cast %136 : vector<1x8x1xf32> to vector<8x1xf32>
    %cst_116 = arith.constant dense<0xFF800000> : vector<8xf32>
    %138 = vector.multi_reduction <maximumf>, %135, %cst_116 [1] : vector<8x8xf32> to vector<8xf32>
    %139 = vector.shape_cast %138 : vector<8xf32> to vector<8x1xf32>
    %140 = arith.maximumf %137, %139 : vector<8x1xf32>
    %141 = arith.subf %137, %140 : vector<8x1xf32>
    %142 = math.exp %141 : vector<8x1xf32>
    %143 = vector.broadcast %140 : vector<8x1xf32> to vector<8x8xf32>
    %144 = arith.subf %135, %143 : vector<8x8xf32>
    %145 = math.exp %144 : vector<8x8xf32>
    %c3_117 = arith.constant 3 : index
    %c0_118 = arith.constant 0 : index
    %c0_119 = arith.constant 0 : index
    %146 = vector.load %arg13[%c3_117, %c0_118, %c0_119] : memref<4x8x1xf32, #tpu.memory_space<vmem>>, vector<1x8x1xf32>
    %147 = vector.shape_cast %146 : vector<1x8x1xf32> to vector<8x1xf32>
    %148 = arith.mulf %142, %147 : vector<8x1xf32>
    %cst_120 = arith.constant dense<0.000000e+00> : vector<8xf32>
    %149 = vector.multi_reduction <add>, %145, %cst_120 [1] : vector<8x8xf32> to vector<8xf32>
    %150 = vector.shape_cast %149 : vector<8xf32> to vector<8x1xf32>
    %151 = arith.addf %148, %150 : vector<8x1xf32>
    %c3_121 = arith.constant 3 : index
    %c0_122 = arith.constant 0 : index
    %c0_123 = arith.constant 0 : index
    %152 = vector.load %arg13[%c3_121, %c0_122, %c0_123] : memref<4x8x1xf32, #tpu.memory_space<vmem>>, vector<1x8x1xf32>
    %153 = vector.shape_cast %152 : vector<1x8x1xf32> to vector<8x1xf32>
    %154 = vector.shape_cast %151 : vector<8x1xf32> to vector<1x8x1xf32>
    tpu.vector_store %arg13[%c3_121, %c0_122, %c0_123], %154 {strides = array<i32>} : memref<4x8x1xf32, #tpu.memory_space<vmem>>, vector<1x8x1xf32>,
    %c3_124 = arith.constant 3 : index
    %c0_125 = arith.constant 0 : index
    %c0_126 = arith.constant 0 : index
    %155 = vector.load %arg14[%c3_124, %c0_125, %c0_126] : memref<4x8x8xf32, #tpu.memory_space<vmem>>, vector<1x8x8xf32>
    %156 = vector.shape_cast %155 : vector<1x8x8xf32> to vector<8x8xf32>
    %157 = vector.broadcast %142 : vector<8x1xf32> to vector<8x8xf32>
    %158 = arith.mulf %157, %156 : vector<8x8xf32>
    %cst_127 = arith.constant dense<0.000000e+00> : vector<8x8xf32>
    %159 = tpu.matmul %145, %132, %cst_127 {dimension_numbers = #tpu.dot_dimension_numbers<[1], [0], [0], [1], [0, 0, 1, 1], [], []>} : vector<8x8xf32>, vector<8x8xf32>, vector<8x8xf32> -> vector<8x8xf32>
    %160 = arith.addf %158, %159 : vector<8x8xf32>
    %c3_128 = arith.constant 3 : index
    %c0_129 = arith.constant 0 : index
    %c0_130 = arith.constant 0 : index
    %161 = vector.load %arg14[%c3_128, %c0_129, %c0_130] : memref<4x8x8xf32, #tpu.memory_space<vmem>>, vector<1x8x8xf32>
    %162 = vector.shape_cast %161 : vector<1x8x8xf32> to vector<8x8xf32>
    %163 = vector.shape_cast %160 : vector<8x8xf32> to vector<1x8x8xf32>
    tpu.vector_store %arg14[%c3_128, %c0_129, %c0_130], %163 {strides = array<i32>} : memref<4x8x8xf32, #tpu.memory_space<vmem>>, vector<1x8x8xf32>,
    %c3_131 = arith.constant 3 : index
    %c0_132 = arith.constant 0 : index
    %c0_133 = arith.constant 0 : index
    %164 = vector.load %arg12[%c3_131, %c0_132, %c0_133] : memref<4x8x1xf32, #tpu.memory_space<vmem>>, vector<1x8x1xf32>
    %165 = vector.shape_cast %164 : vector<1x8x1xf32> to vector<8x1xf32>
    %166 = vector.shape_cast %140 : vector<8x1xf32> to vector<1x8x1xf32>
    tpu.vector_store %arg12[%c3_131, %c0_132, %c0_133], %166 {strides = array<i32>} : memref<4x8x1xf32, #tpu.memory_space<vmem>>, vector<1x8x1xf32>,
    %c1_i32 = arith.constant 1 : i32
    %167 = arith.cmpi eq, %arg2, %c1_i32 : i32
    %168 = arith.extui %167 : i1 to i32
    %c0_i32_134 = arith.constant 0 : i32
    %169 = arith.cmpi ne, %168, %c0_i32_134 : i32
    scf.if %169 {
      %cst_135 = arith.constant 0.000000e+00 : f32
      %170 = vector.broadcast %cst_135 : f32 to vector<8x32xf32>
      %c0_136 = arith.constant 0 : index
      %c0_137 = arith.constant 0 : index
      %c0_138 = arith.constant 0 : index
      %171 = vector.load %arg13[%c0_136, %c0_137, %c0_138] : memref<4x8x1xf32, #tpu.memory_space<vmem>>, vector<1x8x1xf32>
      %172 = vector.shape_cast %171 : vector<1x8x1xf32> to vector<8x1xf32>
      %173 = tpu.reciprocal %172 {approx = true} : vector<8x1xf32> -> vector<8x1xf32>
      %c0_139 = arith.constant 0 : index
      %c0_140 = arith.constant 0 : index
      %c0_141 = arith.constant 0 : index
      %174 = vector.load %arg14[%c0_139, %c0_140, %c0_141] : memref<4x8x8xf32, #tpu.memory_space<vmem>>, vector<1x8x8xf32>
      %175 = vector.shape_cast %174 : vector<1x8x8xf32> to vector<8x8xf32>
      %176 = vector.broadcast %173 : vector<8x1xf32> to vector<8x8xf32>
      %177 = arith.mulf %175, %176 : vector<8x8xf32>
      %c0_142 = arith.constant 0 : index
      %c0_143 = arith.constant 0 : index
      %c0_144 = arith.constant 0 : index
      %178 = vector.load %arg9[%c0_142, %c0_143, %c0_144] : memref<4x8x32xf32, #tpu.memory_space<vmem>>, vector<1x8x32xf32>
      %179 = vector.shape_cast %178 : vector<1x8x32xf32> to vector<8x32xf32>
      %cst_145 = arith.constant dense<0.000000e+00> : vector<8x32xf32>
      %180 = tpu.matmul %177, %179, %cst_145 {dimension_numbers = #tpu.dot_dimension_numbers<[1], [0], [0], [1], [0, 0, 1, 1], [], []>} : vector<8x8xf32>, vector<8x32xf32>, vector<8x32xf32> -> vector<8x32xf32>
      %181 = arith.addf %170, %180 : vector<8x32xf32>
      %c1_146 = arith.constant 1 : index
      %c0_147 = arith.constant 0 : index
      %c0_148 = arith.constant 0 : index
      %182 = vector.load %arg13[%c1_146, %c0_147, %c0_148] : memref<4x8x1xf32, #tpu.memory_space<vmem>>, vector<1x8x1xf32>
      %183 = vector.shape_cast %182 : vector<1x8x1xf32> to vector<8x1xf32>
      %184 = tpu.reciprocal %183 {approx = true} : vector<8x1xf32> -> vector<8x1xf32>
      %c1_149 = arith.constant 1 : index
      %c0_150 = arith.constant 0 : index
      %c0_151 = arith.constant 0 : index
      %185 = vector.load %arg14[%c1_149, %c0_150, %c0_151] : memref<4x8x8xf32, #tpu.memory_space<vmem>>, vector<1x8x8xf32>
      %186 = vector.shape_cast %185 : vector<1x8x8xf32> to vector<8x8xf32>
      %187 = vector.broadcast %184 : vector<8x1xf32> to vector<8x8xf32>
      %188 = arith.mulf %186, %187 : vector<8x8xf32>
      %c1_152 = arith.constant 1 : index
      %c0_153 = arith.constant 0 : index
      %c0_154 = arith.constant 0 : index
      %189 = vector.load %arg9[%c1_152, %c0_153, %c0_154] : memref<4x8x32xf32, #tpu.memory_space<vmem>>, vector<1x8x32xf32>
      %190 = vector.shape_cast %189 : vector<1x8x32xf32> to vector<8x32xf32>
      %cst_155 = arith.constant dense<0.000000e+00> : vector<8x32xf32>
      %191 = tpu.matmul %188, %190, %cst_155 {dimension_numbers = #tpu.dot_dimension_numbers<[1], [0], [0], [1], [0, 0, 1, 1], [], []>} : vector<8x8xf32>, vector<8x32xf32>, vector<8x32xf32> -> vector<8x32xf32>
      %192 = arith.addf %181, %191 : vector<8x32xf32>
      %c2_156 = arith.constant 2 : index
      %c0_157 = arith.constant 0 : index
      %c0_158 = arith.constant 0 : index
      %193 = vector.load %arg13[%c2_156, %c0_157, %c0_158] : memref<4x8x1xf32, #tpu.memory_space<vmem>>, vector<1x8x1xf32>
      %194 = vector.shape_cast %193 : vector<1x8x1xf32> to vector<8x1xf32>
      %195 = tpu.reciprocal %194 {approx = true} : vector<8x1xf32> -> vector<8x1xf32>
      %c2_159 = arith.constant 2 : index
      %c0_160 = arith.constant 0 : index
      %c0_161 = arith.constant 0 : index
      %196 = vector.load %arg14[%c2_159, %c0_160, %c0_161] : memref<4x8x8xf32, #tpu.memory_space<vmem>>, vector<1x8x8xf32>
      %197 = vector.shape_cast %196 : vector<1x8x8xf32> to vector<8x8xf32>
      %198 = vector.broadcast %195 : vector<8x1xf32> to vector<8x8xf32>
      %199 = arith.mulf %197, %198 : vector<8x8xf32>
      %c2_162 = arith.constant 2 : index
      %c0_163 = arith.constant 0 : index
      %c0_164 = arith.constant 0 : index
      %200 = vector.load %arg9[%c2_162, %c0_163, %c0_164] : memref<4x8x32xf32, #tpu.memory_space<vmem>>, vector<1x8x32xf32>
      %201 = vector.shape_cast %200 : vector<1x8x32xf32> to vector<8x32xf32>
      %cst_165 = arith.constant dense<0.000000e+00> : vector<8x32xf32>
      %202 = tpu.matmul %199, %201, %cst_165 {dimension_numbers = #tpu.dot_dimension_numbers<[1], [0], [0], [1], [0, 0, 1, 1], [], []>} : vector<8x8xf32>, vector<8x32xf32>, vector<8x32xf32> -> vector<8x32xf32>
      %203 = arith.addf %192, %202 : vector<8x32xf32>
      %c3_166 = arith.constant 3 : index
      %c0_167 = arith.constant 0 : index
      %c0_168 = arith.constant 0 : index
      %204 = vector.load %arg13[%c3_166, %c0_167, %c0_168] : memref<4x8x1xf32, #tpu.memory_space<vmem>>, vector<1x8x1xf32>
      %205 = vector.shape_cast %204 : vector<1x8x1xf32> to vector<8x1xf32>
      %206 = tpu.reciprocal %205 {approx = true} : vector<8x1xf32> -> vector<8x1xf32>
      %c3_169 = arith.constant 3 : index
      %c0_170 = arith.constant 0 : index
      %c0_171 = arith.constant 0 : index
      %207 = vector.load %arg14[%c3_169, %c0_170, %c0_171] : memref<4x8x8xf32, #tpu.memory_space<vmem>>, vector<1x8x8xf32>
      %208 = vector.shape_cast %207 : vector<1x8x8xf32> to vector<8x8xf32>
      %209 = vector.broadcast %206 : vector<8x1xf32> to vector<8x8xf32>
      %210 = arith.mulf %208, %209 : vector<8x8xf32>
      %c3_172 = arith.constant 3 : index
      %c0_173 = arith.constant 0 : index
      %c0_174 = arith.constant 0 : index
      %211 = vector.load %arg9[%c3_172, %c0_173, %c0_174] : memref<4x8x32xf32, #tpu.memory_space<vmem>>, vector<1x8x32xf32>
      %212 = vector.shape_cast %211 : vector<1x8x32xf32> to vector<8x32xf32>
      %cst_175 = arith.constant dense<0.000000e+00> : vector<8x32xf32>
      %213 = tpu.matmul %210, %212, %cst_175 {dimension_numbers = #tpu.dot_dimension_numbers<[1], [0], [0], [1], [0, 0, 1, 1], [], []>} : vector<8x8xf32>, vector<8x32xf32>, vector<8x32xf32> -> vector<8x32xf32>
      %214 = arith.addf %203, %213 : vector<8x32xf32>
      %c0_176 = arith.constant 0 : index
      %c0_177 = arith.constant 0 : index
      %c0_178 = arith.constant 0 : index
      %215 = vector.load %arg10[%c0_176, %c0_177, %c0_178] : memref<1x8x32xf32, #tpu.memory_space<vmem>>, vector<1x8x32xf32>
      %216 = vector.shape_cast %215 : vector<1x8x32xf32> to vector<8x32xf32>
      %217 = vector.shape_cast %214 : vector<8x32xf32> to vector<1x8x32xf32>
      tpu.vector_store %arg10[%c0_176, %c0_177, %c0_178], %217 {strides = array<i32>} : memref<1x8x32xf32, #tpu.memory_space<vmem>>, vector<1x8x32xf32>,
    } else {
    }
    return
  }
  func.func @transform_0(%arg0: i32, %arg1: i32, %arg2: i32) -> (i32, i32, i32) {
    %c0_i32 = arith.constant 0 : i32
    %c0_i32_0 = arith.constant 0 : i32
    return %arg0, %arg1, %c0_i32 : i32, i32, i32
  }
  func.func @transform_1(%arg0: i32, %arg1: i32, %arg2: i32) -> (i32, i32, i32) {
    %c0_i32 = arith.constant 0 : i32
    %c0_i32_0 = arith.constant 0 : i32
    return %arg0, %arg2, %c0_i32 : i32, i32, i32
  }
  func.func @transform_2(%arg0: i32, %arg1: i32, %arg2: i32) -> (i32, i32, i32) {
    %c0_i32 = arith.constant 0 : i32
    %c0_i32_0 = arith.constant 0 : i32
    return %arg0, %arg2, %c0_i32 : i32, i32, i32
  }
  func.func @transform_3(%arg0: i32, %arg1: i32, %arg2: i32) -> (i32, i32, i32) {
    %c0_i32 = arith.constant 0 : i32
    %c0_i32_0 = arith.constant 0 : i32
    %c0_i32_1 = arith.constant 0 : i32
    %c0_i32_2 = arith.constant 0 : i32
    return %c0_i32, %c0_i32_0, %c0_i32_1 : i32, i32, i32
  }
  func.func @transform_4(%arg0: i32, %arg1: i32, %arg2: i32) -> (i32, i32, i32) {
    %c0_i32 = arith.constant 0 : i32
    %c0_i32_0 = arith.constant 0 : i32
    %c0_i32_1 = arith.constant 0 : i32
    %c0_i32_2 = arith.constant 0 : i32
    return %c0_i32, %c0_i32_0, %c0_i32_1 : i32, i32, i32
  }
  func.func @transform_5(%arg0: i32, %arg1: i32, %arg2: i32) -> (i32, i32, i32) {
    %c0_i32 = arith.constant 0 : i32
    %c0_i32_0 = arith.constant 0 : i32
    %c0_i32_1 = arith.constant 0 : i32
    %c0_i32_2 = arith.constant 0 : i32
    return %c0_i32, %c0_i32_0, %c0_i32_1 : i32, i32, i32
  }
  func.func @transform_6(%arg0: i32, %arg1: i32, %arg2: i32) -> (i32, i32, i32) {
    %c0_i32 = arith.constant 0 : i32
    %c0_i32_0 = arith.constant 0 : i32
    %c0_i32_1 = arith.constant 0 : i32
    %c0_i32_2 = arith.constant 0 : i32
    return %c0_i32, %c0_i32_0, %c0_i32_1 : i32, i32, i32
  }
  func.func @transform_7(%arg0: i32, %arg1: i32, %arg2: i32) -> (i32, i32, i32) {
    %c0_i32 = arith.constant 0 : i32
    %c0_i32_0 = arith.constant 0 : i32
    return %arg0, %arg1, %c0_i32 : i32, i32, i32
  }
}

</mosaic_0001>

<bundles_post_ra>
// kernel: tpu_custom_call.1
= control target key start
LH: loop header
LB: loop body
LE: loop exit
PB: predicated region body
PF: predicated region fallthrough
CT: control target
= control target key end

     0   :  { %12 = vsyncpa [#allocation7], 0  ;;  %s3730_s0 = inlined_call_operand.vmem [shape: f32[2,16,32], index: 0, kind: input, shape index: {}]   ;;  %s3731_s1 = inlined_call_operand.vmem [shape: f32[2,16,32], index: 1, kind: input, shape index: {}]   ;;  %s3732_s2 = inlined_call_operand.vmem [shape: f32[2,16,32], index: 2, kind: input, shape index: {}]   ;;  %s3733_s3 = inlined_call_operand.vmem [shape: f32[4,32,8], index: 3, kind: input, shape index: {}]   ;;  %s3734_s4 = inlined_call_operand.vmem [shape: f32[4,32,8], index: 4, kind: input, shape index: {}]   ;;  %s3735_s5 = inlined_call_operand.vmem [shape: f32[4,32,8], index: 5, kind: input, shape index: {}]   ;;  %s3736_s6 = inlined_call_operand.vmem [shape: f32[4,8,32], index: 6, kind: input, shape index: {}]   ;;  %s3737_s7 = inlined_call_operand.hbm [shape: f32[2,16,32], index: 7, kind: output, shape index: {}]  }
   0x1   :  { %14 = vsyncpa [#allocation7 + $0x1], 0  ;;  %s3177_s24 = smov 0   ;;  %s3179_s25 = smov 0  }
   0x2   :  { %s3181_s26 = smov 0   ;;  %s3183_s27 = smov 0  }
   0x3   :  { %s3185_s28 = smov 0   ;;  %s3187_s29 = smov 0  }
   0x4   :  { %s3189_s30 = smov 0   ;;  %s3191_s8 = smov 0  }
   0x5   :  { %s3193_s9 = smov 0   ;;  %s3195_s10 = smov 0  }
   0x6 LB: > { %3747 = sst [smem:[#allocation9_spill]] %s3089_s24  ;;  %s2531_s11 = sadd.s32 4294967295, %s3125_s10   ;;  %s3125_s10 = sphi %s3195_s10, %s20_s10   ;;  %s3121_s9 = sphi %s3193_s9, %s3769_s9   ;;  %s3117_s8 = sphi %s3191_s8, %s3768_s8   ;;  %s3113_s30 = sphi %s3189_s30, %s3767_s30   ;;  %s3109_s29 = sphi %s3187_s29, %s3766_s29   ;;  %s3105_s28 = sphi %s3185_s28, %s3765_s28   ;;  %s3101_s27 = sphi %s3183_s27, %s3764_s27   ;;  %s3097_s26 = sphi %s3181_s26, %s3763_s26   ;;  %s3093_s25 = sphi %s3179_s25, %s3771_s25   ;;  %s3089_s24 = sphi %s3177_s24, %s3770_s24  }
   0x7   : > { %3748 = sst [smem:[#allocation10_spill]] %s3097_s26  ;;  %s2532_s12 = sadd.s32 4294967294, %s3125_s10  }
   0x8   : > { %3749 = sst [smem:[#allocation11_spill]] %s3113_s30  ;;  %s32_s13 = sadd.s32 1, %s3113_s30 }
   0x9   : > { %3750 = sst [smem:[#allocation12_spill]] %s3117_s8  ;;  %p33_p0 = scmp.ge.s32.totalorder %s32_s13, 2 }
   0xa   : > { %3751 = sst [smem:[#allocation13_spill]] %s3121_s9  ;;  %s35_s14 = sadd.s32 1, %s3117_s8 }
   0xb   : > { %s39_s15 = sadd.s32 1, %s3121_s9  ;;  %p226_p1 = scmp.ne.s32.totalorder %s3097_s26, %s3093_s25 }
   0xc   : > { %s3773_s13 = smov (%p33_p0, %s32_s13), 0  ;;  %s3775_s14 = smov (!%p33_p0, %s35_s14), %s3117_s8 }
   0xd   : > { %3752 = sst [smem:[#allocation14_spill]] %s3773_s13  ;;  %p227_p2 = scmp.eq.s32.totalorder %s2531_s11, 7 }
   0xe   : > { %p232_p3 = scmp.ne.s32.totalorder %s3093_s25, %s3089_s24  ;;  %p37_p4 = scmp.ge.s32.totalorder %s3775_s14, 2 }
   0xf   : > { %p233_p5 = scmp.eq.s32.totalorder %s2532_s12, 7  ;;  %p3239_p6 = por %p227_p2, %p226_p1 }
  0x10   : > { %s3777_s14 = smov (%p37_p4, %s3775_s14), 0  ;;  %s3779_s15 = smov (!%p37_p4, %s39_s15), %s3121_s9 }
  0x11   : > { %3754 = sst [smem:[#allocation15_spill]] %s3777_s14  ;;  %p3246_p7 = por %p233_p5, %p232_p3 }
  0x12   : > { %p2535_p8 = scmp.ge.s32.totalorder %s3125_s10, 1  ;;  %p41_p9 = scmp.ge.s32.totalorder %s3779_s15, 2 }
  0x13   : > { %s3755_s17 = scalar_select %p3246_p7, 1, 0 }
  0x14   : > { %p296_p10 = scmp.lt.s32.totalorder %s3125_s10, 9  ;;  %s212_s18 = ssub.s32 %s3117_s8, %s3777_s14 }
  0x15   : > { %3756 = sst [smem:[#allocation16_spill]] %s3755_s17  ;;  %s3781_s15 = smov (%p41_p9, %s3779_s15), 0 }
  0x16   : > { %3757 = sst [smem:[#allocation17_spill]] %s3781_s15  ;;  %p297_p11 = pnand %p2535_p8, %p296_p10 }
  0x17   : > { %s211_s19 = ssub.s32 %s3121_s9, %s3781_s15  ;;  %s216_s21 = sadd.s32 1, %s3097_s26 }
  0x18   : > { %s213_s20 = sor.u32 %s212_s18, %s211_s19  ;;  %s3744_s23 = sand.u32 (!%p297_p11), 1, %s3093_s25  }
  0x19   : > { %p214_p12 = scmp.eq.s32.totalorder %s213_s20, 0  ;;  %300 = sbr.rel (%p297_p11) target bundleno = 2117 (0x845), region = 48 }
  0x1a   : > { %p347_p13 = scmp.lt.s32.totalorder (!%p297_p11), %s3109_s29, 1  ;;  %s3266_s11 = sshll.u32 (!%p297_p11), %s3744_s23, 3 }
  0x1b   : > { %s3260_s22 = scalar_select %p214_p12, %s3097_s26, %s216_s21  }
  0x1c   : > { %p349_p0 = scmp.lt.s32.totalorder (!%p297_p11), %s3105_s28, 1  ;;  %p357_p1 = scmp.lt.s32.totalorder (!%p297_p11), %s3101_s27, 1 }
  0x1d   : > { %3758 = sst [smem:[#allocation18_spill]] %s3260_s22  ;;  %p2543_p2 = scmp.ne.s32.totalorder (!%p297_p11), %s3101_s27, 0 }
  0x1e   : > { %s348_s12 = scalar_select %p347_p13, %s3109_s29, 1 }
  0x1f   : > { %s350_s18 = scalar_select %p349_p0, %s3105_s28, 1 }
  0x20   : > { %s2537_s19 = sshll.u32 %s348_s12, 1 }
  0x21   : > { %s352_s20 = sadd.s32 %s2537_s19, %s350_s18  ;;  %s346_s18 = scalar_lea.vmem [#allocation6], %s3266_s11 }
  0x22   : > { %s2538_s21 = sshll.u32 %s352_s20, 3 }
  0x23   : > { %s3275_s13 = scalar_lea.vmem %s3730_s0, %s2538_s21 }
  0x24   : > { %s358_s9 = scalar_select %p357_p1, %s3101_s27, 1 }
  0x25   : > { %374 = sbr.rel (%p2543_p2) target bundleno = 257 (0x101), region = 52 }
  0x26   : > { %s360_s8 = sadd.s32 %s2537_s19, %s358_s9 }
  0x27   : > { %s2540_s30 = sshll.u32 %s360_s8, 3 }
  0x28   : > { %s3281_s23 = scalar_lea.vmem %s3731_s1, %s2540_s30  ;;  %s3286_s12 = scalar_lea.vmem %s3732_s2, %s2540_s30 }
  0x2a   : > { %vm687_vm0 = vcmask 7168   ;;  %v379_v0 = vld [vmem:[%s3733_s3 + $0x18] sm:$0xff]  ;;  %v3127_v2 = vmov 0.0   ;;  %v3128_v3 = vmov -inf   ;;  %v378_v4 = vld [vmem:[%s3733_s3 + $0x10] sm:$0xff]  ;;  %v377_v6 = vld [vmem:[%s3733_s3 + $0x8] sm:$0xff] }
  0x2b   : > { %v2548_v1 = vld [vmem:[%s3733_s3 + $0x38] sm:$0xff]  ;;  %2701 = vmatprep.subr.mxu0 %v3127_v2  ;;  %688 = vst.msk [vmem:[#allocation3] sm:$0xff] %vm687_vm0, %v3128_v3  ;;  %689 = vst.msk [vmem:[#allocation3 + $0x8] sm:$0xff] %vm687_vm0, %v3128_v3  ;;  %2712 = vmatprep.subr.mxu1 %v3127_v2  ;;  %v2547_v5 = vld [vmem:[%s3733_s3 + $0x30] sm:$0xff]  ;;  %vm380_vm1 = vcmask 261120   ;;  %vm3129_vm2 = vmmov 0  }
  0x2c   : > { %690 = vst.msk [vmem:[#allocation3 + $0x10] sm:$0xff] %vm687_vm0, %v3128_v3  ;;  %691 = vst.msk [vmem:[#allocation3 + $0x18] sm:$0xff] %vm687_vm0, %v3128_v3  ;;  %2702 = vmatpush3.msra.mxu0 %v379_v0  ;;  %2713 = vmatpush3.msra.mxu1 %v2548_v1  ;;  %v2546_v7 = vld [vmem:[%s3733_s3 + $0x28] sm:$0xff]  ;;  %v376_v8 = vld [vmem:[%s3733_s3] sm:$0xff]  ;;  %vm454_vm3 = vcmask 64512  }
  0x2d   : > { %692 = vst.msk [vmem:[#allocation4] sm:$0xff] %vm687_vm0, %v3127_v2  ;;  %693 = vst.msk [vmem:[#allocation4 + $0x8] sm:$0xff] %vm687_vm0, %v3127_v2  ;;  %2703 = vmatprep.subr.mxu0 %v3127_v2  ;;  %2714 = vmatprep.subr.mxu1 %v3127_v2  ;;  %v2545_v9 = vld [vmem:[%s3733_s3 + $0x20] sm:$0xff]  ;;  %v2553_v11 = vld [vmem:[%s3733_s3 + $0x58] sm:$0xff] }
  0x2e   : > { %694 = vst.msk [vmem:[#allocation4 + $0x10] sm:$0xff] %vm687_vm0, %v3127_v2  ;;  %695 = vst.msk [vmem:[#allocation4 + $0x18] sm:$0xff] %vm687_vm0, %v3127_v2  ;;  %2704 = vmatpush3.msra.mxu0 %v378_v4  ;;  %2715 = vmatpush3.msra.mxu1 %v2547_v5  ;;  %v375_v10 = vld [vmem:[%s3275_s13] sm:$0xff]  ;;  %v2558_v12 = vld [vmem:[%s3733_s3 + $0x78] sm:$0xff] }
  0x2f   : > { %2705 = vmatprep.subr.mxu0 %v3127_v2  ;;  %2716 = vmatprep.subr.mxu1 %v3127_v2  ;;  %v2552_v13 = vld [vmem:[%s3733_s3 + $0x50] sm:$0xff]  ;;  %v2551_v15 = vld [vmem:[%s3733_s3 + $0x48] sm:$0xff]  ;;  %v2550_v17 = vld [vmem:[%s3733_s3 + $0x40] sm:$0xff]  ;;  %696 = vst.msk [vmem:[#allocation5] sm:$0xff] %vm454_vm3, %v3127_v2 }
  0x30   : > { %2706 = vmatpush3.msra.mxu0 %v377_v6  ;;  %2717 = vmatpush3.msra.mxu1 %v2546_v7  ;;  %v2557_v14 = vld [vmem:[%s3733_s3 + $0x70] sm:$0xff]  ;;  %v2556_v16 = vld [vmem:[%s3733_s3 + $0x68] sm:$0xff]  ;;  %v2555_v18 = vld [vmem:[%s3733_s3 + $0x60] sm:$0xff]  ;;  %697 = vst.msk [vmem:[#allocation5 + $0x8] sm:$0xff] %vm454_vm3, %v3127_v2 }
  0x31   : > { %2707 = vmatprep.subr.mxu0 %v3127_v2  ;;  %2718 = vmatprep.subr.mxu1 %v3127_v2  ;;  %698 = vst.msk [vmem:[#allocation5 + $0x10] sm:$0xff] %vm454_vm3, %v3127_v2  ;;  %699 = vst.msk [vmem:[#allocation5 + $0x18] sm:$0xff] %vm454_vm3, %v3127_v2 }
  0x32   : > { %2708 = vmatpush3.msra.mxu0 %v376_v8  ;;  %2709 = vmatprep.mubr.msk.f32.mxu0 %vm3129_vm2, %v3127_v2 }
  0x33   : > { %2719 = vmatpush3.msra.mxu1 %v2545_v9  ;;  %2720 = vmatprep.mubr.msk.f32.mxu1 %vm3129_vm2, %v3127_v2 }
  0x34   : > { %2710 = vmatmul.mubr.msk.f32.vlgmr.msra.gmra.mxu0 %vm380_vm1, %v375_v10  ;;  %2721 = vmatmul.mubr.msk.f32.vlgmr.msra.gmra.mxu1 %vm380_vm1, %v375_v10 }
  0x35   : > { %2723 = vmatprep.subr.mxu0 %v3127_v2  ;;  %2734 = vmatprep.subr.mxu1 %v3127_v2 }
  0x36   : > { %2724 = vmatpush3.msra.mxu0 %v2553_v11  ;;  %2735 = vmatpush3.msra.mxu1 %v2558_v12 }
  0x37   : > { %2725 = vmatprep.subr.mxu0 %v3127_v2  ;;  %2736 = vmatprep.subr.mxu1 %v3127_v2 }
  0x38   : > { %2726 = vmatpush3.msra.mxu0 %v2552_v13  ;;  %2737 = vmatpush3.msra.mxu1 %v2557_v14 }
  0x39   : > { %2727 = vmatprep.subr.mxu0 %v3127_v2  ;;  %2738 = vmatprep.subr.mxu1 %v3127_v2 }
  0x3a   : > { %2728 = vmatpush3.msra.mxu0 %v2551_v15  ;;  %2739 = vmatpush3.msra.mxu1 %v2556_v16 }
  0x3b   : > { %2729 = vmatprep.subr.mxu0 %v3127_v2  ;;  %2740 = vmatprep.subr.mxu1 %v3127_v2 }
  0x3c   : > { %2730 = vmatpush3.msra.mxu0 %v2550_v17  ;;  %2731 = vmatprep.mubr.msk.f32.mxu0 %vm3129_vm2, %v3127_v2 }
  0x3d   : > { %2741 = vmatpush3.msra.mxu1 %v2555_v18  ;;  %2742 = vmatprep.mubr.msk.f32.mxu1 %vm3129_vm2, %v3127_v2 }
  0x3e   : > { %2732 = vmatmul.mubr.msk.f32.vlgmr.msra.gmra.mxu0 %vm380_vm1, %v375_v10  ;;  %2743 = vmatmul.mubr.msk.f32.vlgmr.msra.gmra.mxu1 %vm380_vm1, %v375_v10 }
  0xf4   : > { %v450_v19 = vpop.f32.mrf.mxu0  ;;  %v527_v20 = vpop.f32.mrf.mxu1 }
  0xf5   : > { %455 = vst.msk [vmem:[#allocation2] sm:$0xff] %vm454_vm3, %v450_v19  ;;  %532 = vst.msk [vmem:[#allocation2 + $0x8] sm:$0xff] %vm454_vm3, %v527_v20 }
  0xf6   : > { %v2711_v21 = vpop.f32.mrf.mxu0  ;;  %v2722_v22 = vpop.f32.mrf.mxu1 }
  0xfe   : > { %v604_v23 = vpop.f32.mrf.mxu0  ;;  %v681_v24 = vpop.f32.mrf.mxu1 }
  0xff   : > { %609 = vst.msk [vmem:[#allocation2 + $0x10] sm:$0xff] %vm454_vm3, %v604_v23  ;;  %686 = vst.msk [vmem:[#allocation2 + $0x18] sm:$0xff] %vm454_vm3, %v681_v24 }
 0x100   : > { %v2733_v25 = vpop.f32.mrf.mxu0  ;;  %v2744_v26 = vpop.f32.mrf.mxu1 }
 0x101 PF: > { %v705_v27 = vld [vmem:[%s3734_s4 + $0x18] sm:$0xff]  ;;  %v3130_v28 = vmov 0.0   ;;  %v704_v29 = vld [vmem:[%s3734_s4 + $0x10] sm:$0xff]  ;;  %vm3131_vm4 = vmmov 0   ;;  %v703_v30 = vld [vmem:[%s3734_s4 + $0x8] sm:$0xff]  ;;  %vm706_vm5 = vcmask 261120  }
 0x102   : > { %2745 = vmatprep.subr.mxu0 %v3130_v28  ;;  %2753 = vmatprep.mubr.msk.f32.mxu0 %vm3131_vm4, %v3130_v28  ;;  %v702_v31 = vld [vmem:[%s3734_s4] sm:$0xff]  ;;  %vm858_vm6 = vcmask 64512   ;;  %v2568_v36 = vld [vmem:[%s3734_s4 + $0x38] sm:$0xff]  ;;  %v2567_v37 = vld [vmem:[%s3734_s4 + $0x30] sm:$0xff]  ;;  %v3132_v54 = vmov 0   ;;  %vm957_vm7 = vcmask 7168  }
 0x103   : > { %2746 = vmatpush3.msra.mxu0 %v705_v27  ;;  %2756 = vmatprep.subr.mxu1 %v3130_v28  ;;  %v3396_v32 = vld [vmem:[%s3281_s23] sm:$0xff]  ;;  %v2566_v38 = vld [vmem:[%s3734_s4 + $0x28] sm:$0xff]  ;;  %v783_v40 = vld [vmem:[%s3735_s5 + $0x18] sm:$0xff]  ;;  %p2604_p3 = scmp.ne.s32.totalorder %s3101_s27, 1 }
 0x104   : > { %2747 = vmatprep.subr.mxu0 %v3130_v28  ;;  %2764 = vmatprep.mubr.msk.f32.mxu1 %vm3131_vm4, %v3130_v28  ;;  %v857_v34 = vld [vmem:[#allocation2] sm:$0xff]  ;;  %v782_v41 = vld [vmem:[%s3735_s5 + $0x10] sm:$0xff]  ;;  %v781_v42 = vld [vmem:[%s3735_s5 + $0x8] sm:$0xff] }
 0x105   : > { %2748 = vmatpush3.msra.mxu0 %v704_v29  ;;  %v2565_v39 = vld [vmem:[%s3734_s4 + $0x20] sm:$0xff]  ;;  %2757 = vmatpush3.msra.mxu1 %v783_v40  ;;  %v1193_v49 = vld [vmem:[#allocation2 + $0x8] sm:$0xff]  ;;  %v2581_v51 = vld [vmem:[%s3734_s4 + $0x58] sm:$0xff] }
 0x106   : > { %2749 = vmatprep.subr.mxu0 %v3130_v28  ;;  %2758 = vmatprep.subr.mxu1 %v3130_v28  ;;  %v780_v43 = vld [vmem:[%s3735_s5] sm:$0xff]  ;;  %v2580_v52 = vld [vmem:[%s3734_s4 + $0x50] sm:$0xff]  ;;  %v2579_v53 = vld [vmem:[%s3734_s4 + $0x48] sm:$0xff] }
 0x107   : > { %2750 = vmatpush3.msra.mxu0 %v703_v30  ;;  %2759 = vmatpush3.msra.mxu1 %v782_v41  ;;  %v3444_v44 = vld [vmem:[%s3286_s12] sm:$0xff]  ;;  %v1530_v2 = vld [vmem:[#allocation2 + $0x10] sm:$0xff]  ;;  %v2594_v4 = vld [vmem:[%s3734_s4 + $0x78] sm:$0xff] }
 0x108   : > { %2751 = vmatprep.subr.mxu0 %v3130_v28  ;;  %2760 = vmatprep.subr.mxu1 %v3130_v28  ;;  %v2578_v55 = vld [vmem:[%s3734_s4 + $0x40] sm:$0xff]  ;;  %v2593_v5 = vld [vmem:[%s3734_s4 + $0x70] sm:$0xff]  ;;  %v2592_v6 = vld [vmem:[%s3734_s4 + $0x68] sm:$0xff] }
 0x109   : > { %2752 = vmatpush3.msra.mxu0 %v702_v31  ;;  %2761 = vmatpush3.msra.mxu1 %v781_v42  ;;  %v3481_v56 = vld [vmem:[#allocation3] sm:$0xff]  ;;  %v2573_v11 = vld [vmem:[%s3735_s5 + $0x38] sm:$0xff]  ;;  %v2572_v13 = vld [vmem:[%s3735_s5 + $0x30] sm:$0xff] }
 0x10a   : > { %2754 = vmatmul.mubr.msk.f32.vlgmr.msra.gmra.mxu0 %vm706_vm5, %v3396_v32  ;;  %2767 = vmatprep.subr.mxu0 %v3130_v28  ;;  %v2591_v7 = vld [vmem:[%s3734_s4 + $0x60] sm:$0xff]  ;;  %v2571_v14 = vld [vmem:[%s3735_s5 + $0x28] sm:$0xff]  ;;  %v1867_v24 = vld [vmem:[#allocation2 + $0x18] sm:$0xff] }
 0x10b   : > { %2769 = vmatprep.mubr.msk.f32.mxu0 %vm3131_vm4, %v3130_v28  ;;  %2762 = vmatprep.subr.mxu1 %v3130_v28  ;;  %v2570_v15 = vld [vmem:[%s3735_s5 + $0x20] sm:$0xff]  ;;  %v3548_v16 = vld [vmem:[#allocation3 + $0x8] sm:$0xff] }
 0x10c   : > { %2763 = vmatpush3.msra.mxu1 %v780_v43  ;;  %2989 = vset.pattern.permute.xlu0 %v3132_v54 }
 0x10d   : > { %2765 = vmatmul.mubr.msk.f32.vlgmr.msra.gmra.mxu1 %vm706_vm5, %v3444_v44  ;;  %2772 = vmatprep.subr.mxu1 %v3130_v28 }
 0x10e   : > { %2774 = vmatprep.mubr.msk.f32.mxu1 %vm3131_vm4, %v3130_v28  ;;  %2990 = vset.pattern.permute.xlu1 %v3132_v54 }
 0x1ca   : > { %v776_v33 = vpop.f32.mrf.mxu0 }
 0x1cb   : > { %2768 = vmatpush3.xpose.msk.msra.mxu0 %vm858_vm6, %v776_v33 }
 0x1cc   : > { %v2755_v35 = vpop.f32.mrf.mxu0  ;;  %2777 = vmatprep.subr.mxu0 %v3130_v28 }
 0x1cd   : > { %v853_v60 = vpop.f32.mrf.mxu1 }
 0x1ce   : > { %2770 = vmatmul.mubr.msk.f32.vlgmr.msra.gmra.mxu0 %vm858_vm6, %v857_v34  ;;  %2773 = vmatpush3.msra.mxu1 %v853_v60  ;;  %v2586_v34 = vld [vmem:[%s3735_s5 + $0x58] sm:$0xff] }
 0x1cf   : > { %2778 = vmatpush3.msra.mxu0 %v2568_v36  ;;  %2785 = vmatprep.mubr.msk.f32.mxu0 %vm3131_vm4, %v3130_v28  ;;  %v2766_v61 = vpop.f32.mrf.mxu1  ;;  %v2585_v36 = vld [vmem:[%s3735_s5 + $0x50] sm:$0xff] }
 0x1d0   : > { %2779 = vmatprep.subr.mxu0 %v3130_v28  ;;  %2788 = vmatprep.subr.mxu1 %v3130_v28  ;;  %v2598_v61 = vld [vmem:[%s3735_s5 + $0x70] sm:$0xff] }
 0x1d1   : > { %2780 = vmatpush3.msra.mxu0 %v2567_v37  ;;  %v2584_v37 = vld [vmem:[%s3735_s5 + $0x48] sm:$0xff] }
 0x1d2   : > { %2781 = vmatprep.subr.mxu0 %v3130_v28 }
 0x1d3   : > { %2782 = vmatpush3.msra.mxu0 %v2566_v38  ;;  %v2583_v38 = vld [vmem:[%s3735_s5 + $0x40] sm:$0xff] }
 0x1d4   : > { %2783 = vmatprep.subr.mxu0 %v3130_v28 }
 0x1d5   : > { %2784 = vmatpush3.msra.mxu0 %v2565_v39  ;;  %v1608_v39 = vld [vmem:[#allocation3 + $0x10] sm:$0xff] }
 0x1d6   : > { %2786 = vmatmul.mubr.msk.f32.vlgmr.msra.gmra.mxu0 %vm706_vm5, %v3396_v32  ;;  %2799 = vmatprep.subr.mxu0 %v3130_v28 }
 0x1d7   : > { %2801 = vmatprep.mubr.msk.f32.mxu0 %vm3131_vm4, %v3130_v28 }
 0x28e   : > { %v3452_v45 = vpop.f32.mrf.mxu0 }
 0x28f   : > { %v936_v46 = vsel %vm858_vm6, %v3452_v45, -inf }
 0x290   : > { %937 = vmax.xlane.f32.xlu0 %v936_v46  ;;  %v2771_v47 = vpop.f32.mrf.mxu0 }
 0x296   : > { %v1113_v48 = vpop.f32.mrf.mxu0 }
 0x297   : > { %2800 = vmatpush3.xpose.msk.msra.mxu0 %vm858_vm6, %v1113_v48 }
 0x298   : > { %v2787_v50 = vpop.f32.mrf.mxu0  ;;  %2809 = vmatprep.subr.mxu0 %v3130_v28 }
 0x29a   : > { %2802 = vmatmul.mubr.msk.f32.vlgmr.msra.gmra.mxu0 %vm858_vm6, %v1193_v49 }
 0x29b   : > { %2810 = vmatpush3.msra.mxu0 %v2581_v51  ;;  %2817 = vmatprep.mubr.msk.f32.mxu0 %vm3131_vm4, %v3130_v28 }
 0x29c   : > { %2811 = vmatprep.subr.mxu0 %v3130_v28 }
 0x29d   : > { %2812 = vmatpush3.msra.mxu0 %v2580_v52 }
 0x29e   : > { %2813 = vmatprep.subr.mxu0 %v3130_v28 }
 0x29f   : > { %2814 = vmatpush3.msra.mxu0 %v2579_v53 }
 0x2a0   : > { %2815 = vmatprep.subr.mxu0 %v3130_v28 }
 0x2a1   : > { %2816 = vmatpush3.msra.mxu0 %v2578_v55 }
 0x2a2   : > { %2818 = vmatmul.mubr.msk.f32.vlgmr.msra.gmra.mxu0 %vm706_vm5, %v3396_v32  ;;  %2831 = vmatprep.subr.mxu0 %v3130_v28 }
 0x2a3   : > { %2833 = vmatprep.mubr.msk.f32.mxu0 %vm3131_vm4, %v3130_v28 }
 0x319   : > { %v938_v57 = vpop.xlane.xlu0 %937 }
 0x31a   : > { %v3484_v58 = vmax.f32 %v3481_v56, %v938_v57 }
 0x31c   : > { %v940_v59 = vsub.f32 %v3481_v56, %v3484_v58  ;;  %1041 = vst.msk [vmem:[#allocation3] sm:$0xff] %vm957_vm7, %v3484_v58  ;;  %945 = vperm.xlu0 %2989, %v3484_v58  }
 0x31e   : > { %v941_v48 = vmul.f32 1.442695, %v940_v59  ;;  %v2599_v59 = vld [vmem:[%s3735_s5 + $0x78] sm:$0xff] }
 0x35a   : > { %v3492_v62 = vpop.f32.mrf.mxu0 }
 0x35b   : > { %v1272_v63 = vsel %vm858_vm6, %v3492_v62, -inf }
 0x35c   : > { %1273 = vmax.xlane.f32.xlu1 %v1272_v63  ;;  %v2803_v0 = vpop.f32.mrf.mxu0  ;;  %v2596_v63 = vld [vmem:[%s3735_s5 + $0x60] sm:$0xff] }
 0x362   : > { %v1450_v1 = vpop.f32.mrf.mxu0 }
 0x363   : > { %2832 = vmatpush3.xpose.msk.msra.mxu0 %vm858_vm6, %v1450_v1  ;;  %v1945_v1 = vld [vmem:[#allocation3 + $0x18] sm:$0xff] }
 0x364   : > { %v2819_v3 = vpop.f32.mrf.mxu0  ;;  %2841 = vmatprep.subr.mxu0 %v3130_v28 }
 0x366   : > { %2834 = vmatmul.mubr.msk.f32.vlgmr.msra.gmra.mxu0 %vm858_vm6, %v1530_v2 }
 0x367   : > { %2842 = vmatpush3.msra.mxu0 %v2594_v4  ;;  %2849 = vmatprep.mubr.msk.f32.mxu0 %vm3131_vm4, %v3130_v28  ;;  %v1288_v4 = vld [vmem:[#allocation4 + $0x8] sm:$0xff] }
 0x368   : > { %2843 = vmatprep.subr.mxu0 %v3130_v28 }
 0x369   : > { %2844 = vmatpush3.msra.mxu0 %v2593_v5 }
 0x36a   : > { %2845 = vmatprep.subr.mxu0 %v3130_v28 }
 0x36b   : > { %2846 = vmatpush3.msra.mxu0 %v2592_v6 }
 0x36c   : > { %2847 = vmatprep.subr.mxu0 %v3130_v28 }
 0x36d   : > { %2848 = vmatpush3.msra.mxu0 %v2591_v7 }
 0x36e   : > { %2850 = vmatmul.mubr.msk.f32.vlgmr.msra.gmra.mxu0 %vm706_vm5, %v3396_v32  ;;  %2863 = vmatprep.subr.mxu0 %v3130_v28 }
 0x36f   : > { %2865 = vmatprep.mubr.msk.f32.mxu0 %vm3131_vm4, %v3130_v28 }
 0x397   : > { %v946_v8 = vpop.permute.xlu0 %945 }
 0x398   : > { %v948_v9 = vsub.f32 %v3452_v45, %v946_v8 }
 0x39a   : > { %v949_v10 = vmul.f32 1.442695, %v948_v9 }
 0x39c   : > { %2991 = vpow2.f32 %v949_v10 }
 0x3a9   : > { %v3525_v12 = vpop.eup %2991 }
 0x3aa   : > { %2775 = vmatmul.mubr.msk.f32.vlgmr.msra.gmra.mxu1 %vm858_vm6, %v3525_v12 }
 0x3ab   : > { %2789 = vmatpush3.msra.mxu1 %v2573_v11  ;;  %2796 = vmatprep.mubr.msk.f32.mxu1 %vm3131_vm4, %v3130_v28 }
 0x3ac   : > { %2790 = vmatprep.subr.mxu1 %v3130_v28 }
 0x3ad   : > { %2791 = vmatpush3.msra.mxu1 %v2572_v13  ;;  %v953_v13 = vsel %vm858_vm6, %v3525_v12, 0.0 }
 0x3ae   : > { %2792 = vmatprep.subr.mxu1 %v3130_v28 }
 0x3af   : > { %2793 = vmatpush3.msra.mxu1 %v2571_v14 }
 0x3b0   : > { %2794 = vmatprep.subr.mxu1 %v3130_v28 }
 0x3b1   : > { %2795 = vmatpush3.msra.mxu1 %v2570_v15 }
 0x3b2   : > { %2797 = vmatmul.mubr.msk.f32.vlgmr.msra.gmra.mxu1 %vm706_vm5, %v3444_v44  ;;  %2804 = vmatprep.subr.mxu1 %v3130_v28 }
 0x3b3   : > { %2806 = vmatprep.mubr.msk.f32.mxu1 %vm3131_vm4, %v3130_v28 }
 0x3e5   : > { %v1274_v17 = vpop.xlane.xlu1 %1273 }
 0x3e6   : > { %v3551_v18 = vmax.f32 %v3548_v16, %v1274_v17  ;;  %v1633_v17 = vld [vmem:[#allocation5 + $0x10] sm:$0xff] }
 0x3e8   : > { %v1276_v19 = vsub.f32 %v3548_v16, %v3551_v18  ;;  %1378 = vst.msk [vmem:[#allocation3 + $0x8] sm:$0xff] %vm957_vm7, %v3551_v18  ;;  %1281 = vperm.xlu1 %2990, %v3551_v18  }
 0x3ea   : > { %v1277_v0 = vmul.f32 1.442695, %v1276_v19 }
 0x426   : > { %v1603_v20 = vpop.f32.mrf.mxu0 }
 0x427   : > { %v1609_v21 = vsel %vm858_vm6, %v1603_v20, -inf }
 0x428   : > { %1610 = vmax.xlane.f32.xlu1 %v1609_v21  ;;  %v2835_v22 = vpop.f32.mrf.mxu0 }
 0x42e   : > { %v1787_v23 = vpop.f32.mrf.mxu0 }
 0x42f   : > { %2864 = vmatpush3.xpose.msk.msra.mxu0 %vm858_vm6, %v1787_v23 }
 0x430   : > { %v2851_v25 = vpop.f32.mrf.mxu0 }
 0x432   : > { %2866 = vmatmul.mubr.msk.f32.vlgmr.msra.gmra.mxu0 %vm858_vm6, %v1867_v24 }
 0x463   : > { %v1282_v26 = vpop.permute.xlu1 %1281 }
 0x464   : > { %v1284_v27 = vsub.f32 %v3492_v62, %v1282_v26  ;;  %v2597_v62 = vld [vmem:[%s3735_s5 + $0x68] sm:$0xff] }
 0x466   : > { %v1285_v29 = vmul.f32 1.442695, %v1284_v27 }
 0x468   : > { %2993 = vpow2.f32 %v1285_v29 }
 0x469   : > { %2995 = vpow2.f32 %v941_v48 }
 0x46a   : > { %v3562_v30 = vpop.f32.mrf.mxu1 }
 0x46c   : > { %v2776_v31 = vpop.f32.mrf.mxu1 }
 0x472   : > { %v1188_v32 = vpop.f32.mrf.mxu1 }
 0x473   : > { %2805 = vmatpush3.msra.mxu1 %v1188_v32 }
 0x474   : > { %v2798_v33 = vpop.f32.mrf.mxu1  ;;  %2820 = vmatprep.subr.mxu1 %v3130_v28 }
 0x475   : > { %v2994_v35 = vpop.eup %2993 }
 0x476   : > { %2807 = vmatmul.mubr.msk.f32.vlgmr.msra.gmra.mxu1 %vm858_vm6, %v2994_v35  ;;  %v1290_v47 = vsel %vm858_vm6, %v2994_v35, 0.0  ;;  %v3597_v50 = vpop.eup %2995 }
 0x477   : > { %2821 = vmatpush3.msra.mxu1 %v2586_v34  ;;  %2828 = vmatprep.mubr.msk.f32.mxu1 %vm3131_vm4, %v3130_v28  ;;  %v1296_v34 = vld [vmem:[#allocation5 + $0x8] sm:$0xff] }
 0x478   : > { %2822 = vmatprep.subr.mxu1 %v3130_v28 }
 0x479   : > { %2823 = vmatpush3.msra.mxu1 %v2585_v36 }
 0x47a   : > { %2824 = vmatprep.subr.mxu1 %v3130_v28 }
 0x47b   : > { %2825 = vmatpush3.msra.mxu1 %v2584_v37 }
 0x47c   : > { %2826 = vmatprep.subr.mxu1 %v3130_v28 }
 0x47d   : > { %2827 = vmatpush3.msra.mxu1 %v2583_v38  ;;  %v1625_v38 = vld [vmem:[#allocation4 + $0x10] sm:$0xff] }
 0x47e   : > { %2829 = vmatmul.mubr.msk.f32.vlgmr.msra.gmra.mxu1 %vm706_vm5, %v3444_v44  ;;  %2836 = vmatprep.subr.mxu1 %v3130_v28 }
 0x47f   : > { %2838 = vmatprep.mubr.msk.f32.mxu1 %vm3131_vm4, %v3130_v28 }
 0x4b1   : > { %v1611_v40 = vpop.xlane.xlu1 %1610 }
 0x4b2   : > { %v1612_v41 = vmax.f32 %v1608_v39, %v1611_v40 }
 0x4b4   : > { %v1613_v42 = vsub.f32 %v1608_v39, %v1612_v41  ;;  %1715 = vst.msk [vmem:[#allocation3 + $0x10] sm:$0xff] %vm957_vm7, %v1612_v41  ;;  %1618 = vperm.xlu0 %2989, %v1612_v41  }
 0x4b6   : > { %v1614_v49 = vmul.f32 1.442695, %v1613_v42  ;;  %v1962_v42 = vld [vmem:[#allocation4 + $0x18] sm:$0xff] }
 0x4b8   : > { %2997 = vpow2.f32 %v1614_v49 }
 0x4c5   : > { %v3600_v51 = vpop.eup %2997 }
 0x4c6   : > { %v1626_v39 = vmul.f32 %v3600_v51, %v1625_v38 }
 0x4f2   : > { %v3589_v43 = vpop.f32.mrf.mxu0 }
 0x4f3   : > { %v1946_v45 = vsel %vm858_vm6, %v3589_v43, -inf }
 0x4f4   : > { %1947 = vmax.xlane.f32.xlu0 %v1946_v45  ;;  %v2867_v46 = vpop.f32.mrf.mxu0 }
 0x4f8   : > { %1291 = vadd.xlane.f32.xlu0 %v1290_v47  ;;  %v1970_v47 = vld [vmem:[#allocation5 + $0x18] sm:$0xff] }
 0x50e   : > { %962 = vperm.xlu0 %2989, %v3597_v50  }
 0x512   : > { %1636 = vperm.xlu0 %2989, %v3600_v51  }
 0x52f   : > { %v1619_v52 = vpop.permute.xlu0 %1618 }
 0x530   : > { %v1621_v53 = vsub.f32 %v1603_v20, %v1619_v52 }
 0x532   : > { %v1622_v54 = vmul.f32 1.442695, %v1621_v53 }
 0x534   : > { %2999 = vpow2.f32 %v1622_v54 }
 0x535   : > { %3001 = vpow2.f32 %v1277_v0 }
 0x536   : > { %v3603_v55 = vpop.f32.mrf.mxu1 }
 0x538   : > { %v2808_v57 = vpop.f32.mrf.mxu1 }
 0x53e   : > { %v1525_v56 = vpop.f32.mrf.mxu1 }
 0x53f   : > { %2837 = vmatpush3.msra.mxu1 %v1525_v56 }
 0x540   : > { %v2830_v58 = vpop.f32.mrf.mxu1  ;;  %2852 = vmatprep.subr.mxu1 %v3130_v28 }
 0x541   : > { %v3000_v60 = vpop.eup %2999 }
 0x542   : > { %2839 = vmatmul.mubr.msk.f32.vlgmr.msra.gmra.mxu1 %vm858_vm6, %v3000_v60  ;;  %v3002_v2 = vpop.eup %3001  ;;  %v1627_v14 = vsel %vm858_vm6, %v3000_v60, 0.0 }
 0x543   : > { %2853 = vmatpush3.msra.mxu1 %v2599_v59  ;;  %2860 = vmatprep.mubr.msk.f32.mxu1 %vm3131_vm4, %v3130_v28 }
 0x544   : > { %2854 = vmatprep.subr.mxu1 %v3130_v28 }
 0x545   : > { %2855 = vmatpush3.msra.mxu1 %v2598_v61 }
 0x546   : > { %2856 = vmatprep.subr.mxu1 %v3130_v28 }
 0x547   : > { %2857 = vmatpush3.msra.mxu1 %v2597_v62 }
 0x548   : > { %2858 = vmatprep.subr.mxu1 %v3130_v28 }
 0x549   : > { %2859 = vmatpush3.msra.mxu1 %v2596_v63 }
 0x54a   : > { %2861 = vmatmul.mubr.msk.f32.vlgmr.msra.gmra.mxu1 %vm706_vm5, %v3444_v44  ;;  %2868 = vmatprep.subr.mxu1 %v3130_v28  ;;  %v1289_v44 = vmul.f32 %v3002_v2, %v1288_v4 }
 0x54b   : > { %2870 = vmatprep.mubr.msk.f32.mxu1 %vm3131_vm4, %v3130_v28  ;;  %v959_v28 = vld [vmem:[#allocation5] sm:$0xff] }
 0x57d   : > { %v1948_v3 = vpop.xlane.xlu0 %1947 }
 0x57e   : > { %v1949_v5 = vmax.f32 %v1945_v1, %v1948_v3 }
 0x580   : > { %v1950_v6 = vsub.f32 %v1945_v1, %v1949_v5  ;;  %2052 = vst.msk [vmem:[#allocation3 + $0x18] sm:$0xff] %vm957_vm7, %v1949_v5  ;;  %1955 = vperm.xlu1 %2990, %v1949_v5  }
 0x581   : > { %v1292_v7 = vpop.xlane.xlu0 %1291 }
 0x582   : > { %v1293_v8 = vadd.f32 %v1292_v7, %v1289_v44  ;;  %v1951_v27 = vmul.f32 1.442695, %v1950_v6 }
 0x584   : > { %1294 = vst.msk [vmem:[#allocation4 + $0x8] sm:$0xff] %vm957_vm7, %v1293_v8 }
 0x589   : > { %v963_v9 = vpop.permute.xlu0 %962 }
 0x58a   : > { %v965_v10 = vmul.f32 %v963_v9, %v959_v28 }
 0x58c   : > { %v1039_v11 = vadd.f32 %v3562_v30, %v965_v10  ;;  %v951_v30 = vld [vmem:[#allocation4] sm:$0xff] }
 0x58d   : > { %v1637_v18 = vpop.permute.xlu0 %1636  ;;  %v952_v31 = vmul.f32 %v3597_v50, %v951_v30 }
 0x58e   : > { %1040 = vst.msk [vmem:[#allocation5] sm:$0xff] %vm858_vm6, %v1039_v11  ;;  %v1639_v20 = vmul.f32 %v1637_v18, %v1633_v17 }
 0x5a4   : > { %954 = vadd.xlane.f32.xlu1 %v953_v13 }
 0x5b5   : > { %1299 = vperm.xlu1 %2990, %v3002_v2  }
 0x5d9   : > { %1628 = vadd.xlane.f32.xlu1 %v1627_v14 }
 0x5fb   : > { %v1956_v15 = vpop.permute.xlu1 %1955 }
 0x5fc   : > { %v1958_v16 = vsub.f32 %v3589_v43, %v1956_v15 }
 0x5fe   : > { %v1959_v19 = vmul.f32 1.442695, %v1958_v16 }
 0x600   : > { %3003 = vpow2.f32 %v1959_v19 }
 0x601   : > { %3005 = vpow2.f32 %v1951_v27 }
 0x602   : > { %v1709_v21 = vpop.f32.mrf.mxu1 }
 0x603   : > { %v1713_v22 = vadd.f32 %v1709_v21, %v1639_v20 }
 0x604   : > { %v2840_v23 = vpop.f32.mrf.mxu1 }
 0x605   : > { %1714 = vst.msk [vmem:[#allocation5 + $0x10] sm:$0xff] %vm858_vm6, %v1713_v22 }
 0x60a   : > { %v1862_v24 = vpop.f32.mrf.mxu1 }
 0x60b   : > { %2869 = vmatpush3.msra.mxu1 %v1862_v24 }
 0x60c   : > { %v2862_v12 = vpop.f32.mrf.mxu1 }
 0x60d   : > { %v3004_v25 = vpop.eup %3003 }
 0x60e   : > { %2871 = vmatmul.mubr.msk.f32.vlgmr.msra.gmra.mxu1 %vm858_vm6, %v3004_v25  ;;  %v1964_v26 = vsel %vm858_vm6, %v3004_v25, 0.0  ;;  %v3006_v29 = vpop.eup %3005 }
 0x60f   : > { %1965 = vadd.xlane.f32.xlu0 %v1964_v26  ;;  %v1963_v43 = vmul.f32 %v3006_v29, %v1962_v42 }
 0x625   : > { %1973 = vperm.xlu0 %2989, %v3006_v29  }
 0x62d   : > { %v955_v32 = vpop.xlane.xlu1 %954 }
 0x62e   : > { %v956_v33 = vadd.f32 %v955_v32, %v952_v31 }
 0x630   : > { %958 = vst.msk [vmem:[#allocation4] sm:$0xff] %vm957_vm7, %v956_v33 }
 0x631   : > { %v1300_v35 = vpop.permute.xlu1 %1299 }
 0x632   : > { %v1302_v36 = vmul.f32 %v1300_v35, %v1296_v34 }
 0x634   : > { %v1376_v37 = vadd.f32 %v3603_v55, %v1302_v36 }
 0x636   : > { %1377 = vst.msk [vmem:[#allocation5 + $0x8] sm:$0xff] %vm858_vm6, %v1376_v37 }
 0x662   : > { %v1629_v40 = vpop.xlane.xlu1 %1628 }
 0x663   : > { %v1630_v41 = vadd.f32 %v1629_v40, %v1626_v39 }
 0x665   : > { %1631 = vst.msk [vmem:[#allocation4 + $0x10] sm:$0xff] %vm957_vm7, %v1630_v41 }
 0x698   : > { %v1966_v45 = vpop.xlane.xlu0 %1965 }
 0x699   : > { %v1967_v46 = vadd.f32 %v1966_v45, %v1963_v43 }
 0x69b   : > { %1968 = vst.msk [vmem:[#allocation4 + $0x18] sm:$0xff] %vm957_vm7, %v1967_v46 }
 0x6a0   : > { %v1974_v48 = vpop.permute.xlu0 %1973 }
 0x6a1   : > { %v1976_v49 = vmul.f32 %v1974_v48, %v1970_v47 }
 0x6cd   : > { %2056 = sbr.rel (%p2604_p3) target bundleno = 2092 (0x82c), region = 56 }
 0x6ce   : > { %v2046_v50 = vpop.f32.mrf.mxu1 }
 0x6cf   : > { %v2050_v52 = vadd.f32 %v2046_v50, %v1976_v49 }
 0x6d0   : > { %v2872_v53 = vpop.f32.mrf.mxu1 }
 0x6d1   : > { %2051 = vst.msk [vmem:[#allocation5 + $0x18] sm:$0xff] %vm858_vm6, %v2050_v52 }
 0x6d2   : > { %v2224_v51 = vld [vmem:[#allocation4 + $0x10] sm:$0xff]  ;;  %v2067_v54 = vld [vmem:[#allocation4 + $0x8] sm:$0xff]  ;;  %v2309_v55 = vld [vmem:[#allocation4 + $0x18] sm:$0xff]  ;;  %v3133_v57 = vmov 0   ;;  %v3134_v58 = vmov 0.0   ;;  %vm3135_vm8 = vmmov 0  }
 0x6d3   : > { %3008 = vset.pattern.permute.xlu1 %v3133_v57  ;;  %3007 = vset.pattern.permute.xlu0 %v3133_v57  ;;  %3009 = vrcp.f32 %v2224_v51  ;;  %v2057_v56 = vld [vmem:[#allocation4] sm:$0xff]  ;;  %v2605_v59 = vld [vmem:[%s3736_s6 + $0x8] sm:$0xff]  ;;  %v2226_v2 = vld [vmem:[#allocation5 + $0x10] sm:$0xff] }
 0x6d4   : > { %3011 = vrcp.f32 %v2067_v54  ;;  %2873 = vmatprep.subr.mxu0 %v3134_v58  ;;  %2878 = vmatprep.subr.mxu1 %v3134_v58  ;;  %v2066_v63 = vld [vmem:[%s3736_s6] sm:$0xff]  ;;  %v2069_v1 = vld [vmem:[#allocation5 + $0x8] sm:$0xff]  ;;  %v2608_v6 = vld [vmem:[%s3736_s6 + $0x10] sm:$0xff] }
 0x6d5   : > { %3013 = vrcp.f32 %v2309_v55  ;;  %2874 = vmatpush3.msra.mxu0 %v2605_v59  ;;  %2875 = vmatprep.mubr.msk.f32.mxu0 %vm3135_vm8, %v3134_v58  ;;  %v2059_v44 = vld [vmem:[#allocation5] sm:$0xff]  ;;  %v2610_v9 = vld [vmem:[%s3736_s6 + $0x18] sm:$0xff] }
 0x6d6   : > { %3015 = vrcp.f32 %v2057_v56  ;;  %2883 = vmatprep.subr.mxu0 %v3134_v58  ;;  %2880 = vmatprep.mubr.msk.f32.mxu1 %vm3135_vm8, %v3134_v58 }
 0x6d7   : > { %2879 = vmatpush3.msra.mxu1 %v2066_v63 }
 0x6d8   : > { %2888 = vmatprep.subr.mxu1 %v3134_v58  ;;  %v2311_v10 = vld [vmem:[#allocation5 + $0x18] sm:$0xff] }
 0x6e0   : > { %v3010_v60 = vpop.eup %3009 }
 0x6e1   : > { %v3012_v61 = vpop.eup %3011  ;;  %2229 = vperm.xlu1 %3008, %v3010_v60  }
 0x6e2   : > { %v3014_v62 = vpop.eup %3013  ;;  %2072 = vperm.xlu0 %3007, %v3012_v61  }
 0x6e3   : > { %v3016_v0 = vpop.eup %3015 }
 0x6e5   : > { %2314 = vperm.xlu1 %3008, %v3014_v62  }
 0x6e6   : > { %2062 = vperm.xlu0 %3007, %v3016_v0  }
 0x75c   : > { %v2230_v3 = vpop.permute.xlu1 %2229 }
 0x75d   : > { %v2073_v4 = vpop.permute.xlu0 %2072  ;;  %v2232_v7 = vmul.f32 %v2230_v3, %v2226_v2 }
 0x75e   : > { %v2075_v5 = vmul.f32 %v2073_v4, %v2069_v1 }
 0x760   : > { %2876 = vmatmul.mubr.msk.f32.vlgmr.msra.gmra.mxu0 %vm858_vm6, %v2075_v5  ;;  %v2315_v11 = vpop.permute.xlu1 %2314 }
 0x761   : > { %v2063_v8 = vpop.permute.xlu0 %2062  ;;  %2884 = vmatpush3.msra.mxu0 %v2608_v6  ;;  %2885 = vmatprep.mubr.msk.f32.mxu0 %vm3135_vm8, %v3134_v58  ;;  %v2317_v13 = vmul.f32 %v2315_v11, %v2311_v10 }
 0x762   : > { %v2065_v28 = vmul.f32 %v2063_v8, %v2059_v44 }
 0x764   : > { %2881 = vmatmul.mubr.msk.f32.vlgmr.msra.gmra.mxu1 %vm858_vm6, %v2065_v28  ;;  %2886 = vmatmul.mubr.msk.f32.vlgmr.msra.gmra.mxu0 %vm858_vm6, %v2232_v7 }
 0x765   : > { %2889 = vmatpush3.msra.mxu1 %v2610_v9  ;;  %2890 = vmatprep.mubr.msk.f32.mxu1 %vm3135_vm8, %v3134_v58 }
 0x768   : > { %2891 = vmatmul.mubr.msk.f32.vlgmr.msra.gmra.mxu1 %vm858_vm6, %v2317_v13 }
 0x820   : > { %v2147_v14 = vpop.f32.mrf.mxu0 }
 0x822   : > { %v2877_v15 = vpop.f32.mrf.mxu0 }
 0x824   : > { %v2220_v16 = vpop.f32.mrf.mxu1  ;;  %v2304_v17 = vpop.f32.mrf.mxu0 }
 0x825   : > { %v2221_v18 = vadd.f32 %v2220_v16, %v2147_v14 }
 0x826   : > { %v2882_v19 = vpop.f32.mrf.mxu1  ;;  %v2887_v20 = vpop.f32.mrf.mxu0 }
 0x827   : > { %v2308_v21 = vadd.f32 %v2304_v17, %v2221_v18 }
 0x828   : > { %v2389_v22 = vpop.f32.mrf.mxu1 }
 0x829   : > { %v2393_v23 = vadd.f32 %v2389_v22, %v2308_v21 }
 0x82a   : > { %v2892_v24 = vpop.f32.mrf.mxu1 }
 0x82b   : > { %2394 = vst.msk [vmem:[%s346_s18] sm:$0xff] %vm706_vm5, %v2393_v23 }
 0x82c PF: > { %s2613_s24 = sshll.u32 %s3109_s29, 1  ;;  %s2411_s30 = sshll.u32 %s346_s18, 4  ;;  %s2412_s30 = int_to_ptr.vmem [resolvable:$true] %s2411_s30 }
 0x82d   : > { %s2407_s26 = sadd.s32 %s3105_s28, %s2613_s24  ;;  %s3759_s20 = sand.u32 1, %s3093_s25  }
 0x82e   : > { %s2614_s17 = sshll.u32 %s2407_s26, 7  ;;  %s2396_s21 = scalar_lea.sflag [#allocation7], %s3759_s20 }
 0x82f   : > { %s2409_s19 = scalar_lea.hbm %s3737_s7, %s2614_s17  ;;  %s3017_s14 = scalar_lea.vmem %s2412_s30, 128 }
 0x830   : > { %p3018_p4 = scmp.ne.s32.totalorder %s2412_s30, %s3017_s14  ;;  %s3136_s27 = smov [#allocation6]  }
 0x831   : > { %s3021_s15 = sshll.u32 %s3136_s27, 4  ;;  %s3022_s15 = int_to_ptr.vmem [resolvable:$false] %s3021_s15 }
 0x832   : > { %p3019_p5 = pnand %p3018_p4, %p3239_p6  ;;  %s3023_s29 = scalar_lea.vmem %s3022_s15, 256 }
 0x833   : > { %p3024_p9 = scmp.lt.s32.totalorder %s2412_s30, %s3022_s15  ;;  %p3025_p10 = scmp.lt.s32.totalorder %s3023_s29, %s3017_s14 }
 0x834   : > { %p3020_p8 = pneg %p3019_p5 }
 0x835   : > { %p3026_p11 = por %p3025_p10, %p3024_p9 }
 0x837   : > { %p3027_p12 = pnand %p3026_p11, %p3020_p8 }
 0x839   : > { %3030 = shalt.err (!%p3027_p12)
}
 0x83a   : > { %s3031_s28 = scalar_lea.hbm %s2409_s19, 128  ;;  %s3035_s23 = scalar_lea.hbm %s3737_s7, 512 }
 0x83b   : > { %p3032_p13 = scmp.ne.s32.totalorder %s2409_s19, %s3031_s28  ;;  %p3036_p2 = scmp.lt.s32.totalorder %s2409_s19, %s3737_s7 }
 0x83c   : > { %p3037_p3 = scmp.lt.s32.totalorder %s3035_s23, %s3031_s28 }
 0x83d   : > { %p3033_p0 = pnand %p3032_p13, %p3239_p6 }
 0x83e   : > { %p3038_p4 = por %p3037_p3, %p3036_p2 }
 0x83f   : > { %p3034_p1 = pneg %p3033_p0 }
 0x841   : > { %p3039_p5 = pnand %p3038_p4, %p3034_p1 }
 0x843   : > { %3042 = shalt.err (!%p3039_p5)
}
 0x844   : > { %2893 = dma.vmem_to_hbm [thread:$0]  (%p3239_p6), %s2412_s30, 128, %s2409_s19, %s2396_s21  }
 0x845 PF: > { %s3760_s9 = sld [smem:[#allocation9_spill]]  ;;  %p2899_p8 = scmp.ge.s32.totalorder %s3125_s10, 2 }
 0x847   : > { %p2896_p9 = pnand %p2899_p8, %p3246_p7 }
 0x849   : > { %p2897_p10 = pneg %p2896_p9 }
 0x84b   : > { %s2423_s26 = sand.u32 1, %s3760_s9  }
 0x84c   : > { %s2424_s17 = scalar_lea.sflag [#allocation7], %s2423_s26 }
 0x84d   : > { %3084 = dma.done.wait (%p2897_p10), %s2424_s17, 128  }
 0x84e   : > { %3086 = vsyncadd (%p2897_p10), %s2424_s17, 4294967168  ;;  %s20_s10 = sadd.s32 1, %s3125_s10   ;;  %s3762_s13 = sld [smem:[#allocation10_spill]] }
 0x84f   : > { %p17_p11 = scmp.ge.s32.totalorder %s20_s10, 10   ;;  %s3763_s26 = sld [smem:[#allocation18_spill]] }
 0x850   : > { %s3764_s27 = sld [smem:[#allocation11_spill]]  ;;  %s3770_s24 = smov %s3093_s25 }
 0x851   : > { %s3765_s28 = sld [smem:[#allocation12_spill]]  ;;  %19 = sbr.rel (!%p17_p11) target bundleno = 6 (0x6), region = 124 }
 0x852   : > { %s3766_s29 = sld [smem:[#allocation13_spill]] }
 0x853   : > { %s3767_s30 = sld [smem:[#allocation14_spill]] }
 0x854   : > { %s3768_s8 = sld [smem:[#allocation15_spill]]  ;;  %s3771_s25 = smov %s3762_s13 }
 0x855   : > { %s3769_s9 = sld [smem:[#allocation17_spill]] }
 0x856   :  { %2429 = vsyncpa [#allocation7], 1 }
 0x857   :  { %2431 = vsyncpa [#allocation7 + $0x1], 1 }

</bundles_post_ra>
